<compile_context>
chip_gen: v6e
topology: v6e:2x2x1
jax: 0.10.0
libtpu: 0.0.40
codegen_flags: <defaults>
</compile_context>

<pallas_src>
import functools
import math

import jax
import jax.numpy as jnp
from jax import lax
from jax.experimental import pallas as pl
from jax.experimental.pallas import tpu as pltpu

HIDDEN     = 32                       # DNC_HIDDEN_SIZE
MEMORY     = 16                       # DNC_MEMORY_SIZE
WORD       = 16                       # DNC_WORD_SIZE (must equal MEMORY, see NOTE)
NUM_READS  = 2                        # DNC_READ_HEADS
NUM_WRITES = 1                        # DNC_NUM_WRITE_HEADS
NUM_MODES  = 1 + 2 * NUM_WRITES
EPS        = 0.001

assert WORD == MEMORY, "reference forward only runs when word_size == memory_size"
assert NUM_WRITES == 1, "kernel assumes NUM_WRITES == 1 (link recurrence is dead)"
assert 2 * NUM_READS + 5 <= WORD, "per-step scalar lanes must fit in one WORD group"

# Heads that actually influence the outputs (in packed order).
_USED_SIZES = (
    ("write_vector",    NUM_WRITES * WORD),
    ("erase_vector",    NUM_WRITES * WORD),      # sigmoided --+
    ("free_gate",       NUM_READS),              # sigmoided   |
    ("allocation_gate", NUM_WRITES),             # sigmoided   |  one contiguous
    ("write_gate",      NUM_WRITES),             # sigmoided   |  sigmoid slab
    ("read_mode",       NUM_READS * NUM_MODES),  # sigmoided   |
    ("write_keys",      NUM_WRITES * WORD),      # sigmoided --+
    ("write_strengths", NUM_WRITES),
)
# Dead heads: produced by the reference but never influence any output
# (legacy F.softmax over the size-1 batch dim makes the read content weights 1.0).
_DEAD_SIZES = (
    ("read_keys",       NUM_READS * WORD),
    ("read_strengths",  NUM_READS),
)
_ALL_SIZES = _USED_SIZES + _DEAD_SIZES

_SIZE = dict(_ALL_SIZES)
_OFFS = {}
_o = 0
for _name, _n in _ALL_SIZES:
    _OFFS[_name] = _o
    _o += _n
TOTAL = _o
USED = sum(n for _, n in _USED_SIZES)
USED_P = 8 * ((USED + 7) // 8)                   # pad packed width (59 -> 64)
SIG_BEGIN = _OFFS["erase_vector"]
SIG_END   = _OFFS["write_keys"] + _SIZE["write_keys"]

# Per-step VMEM slab layout: [ write_vector | erase | write_keys | scalars ].
SLAB_WV = 0 * WORD
SLAB_ER = 1 * WORD
SLAB_WK = 2 * WORD
SLAB_SC = 3 * WORD
SLAB_W  = 4 * WORD
# scalar lanes inside the last WORD group:
SC_FG   = 0                      # free gates          (NUM_READS lanes)
SC_AG   = NUM_READS              # allocation gate
SC_WG   = NUM_READS + 1          # write gate
SC_WGT  = NUM_READS + 2          # allocation_gate * write_gate
SC_BETA = NUM_READS + 3          # write strength (raw)
SC_KN   = NUM_READS + 4          # ||write_key||
SC_CM   = NUM_READS + 5          # content read modes  (NUM_READS lanes)


# --------------------------------- the kernel --------------------------------
def _memory_kernel(x_ref, w_ref, b_ref, mem0_ref, rw0_ref, ww0_ref, prec0_ref,
                   usage0_ref,
                   rwords_ref, mem_ref, rw_ref, ww_ref, prec_ref, usage_ref,
                   heads_s, *, t_total, tb):
    f32 = jnp.float32
    c = pl.program_id(0)

    # ---- constants hoisted out of the per-step loop ----
    j_idx = lax.broadcasted_iota(jnp.int32, (MEMORY, MEMORY), 0)
    k_idx = lax.broadcasted_iota(jnp.int32, (MEMORY, MEMORY), 1)
    eye_m = (j_idx == k_idx).astype(f32)
    ones_word = jnp.ones((1, WORD), f32)
    ones_mem  = jnp.ones((1, MEMORY), f32)

    def row_to_col(row):
        """(1, M) -> (M, 1) via a masked lane reduction (no explicit transpose)."""
        return jnp.sum(eye_m * row, axis=1, keepdims=True)

    def softmax_row(row):
        m = jnp.max(row, axis=1, keepdims=True)
        e = jnp.exp(row - m)
        return e / jnp.sum(e, axis=1, keepdims=True)

    def allocation(usage_row):
        """DNC allocation weighting for a (1, M) usage row.

        excl[j] = product of u[k] over all k strictly before j in a stable
        ascending sort of u, computed as exp(log(u) @ before_mask^T): one MXU
        op + one EUP exp instead of a serial 16-step VPU chain.
        (torch.topk tie order is not guaranteed; ties broken by ascending index.)
        """
        u = EPS + (1.0 - EPS) * usage_row                                  # (1, M)
        u_col = row_to_col(u)                                              # (M, 1)
        before = ((u < u_col) | ((u == u_col) & (k_idx < j_idx))).astype(f32)
        excl = jnp.exp(lax.dot_general(jnp.log(u), before,
                                       (((1,), (1,)), ((), ())),
                                       preferred_element_type=f32))        # (1, M)
        return (1.0 - u) * excl

    # ---- initialize the cross-chunk state (held in constant-index out blocks) ----
    @pl.when(c == 0)
    def _():
        mem_ref[0]     = mem0_ref[0]
        rw_ref[0]      = rw0_ref[0]
        ww_ref[0]      = ww0_ref[0]
        prec_ref[0]    = prec0_ref[0]
        usage_ref[...] = usage0_ref[...]

    # ---- chunk-wide, time-parallel precompute (no recurrence) ----
    raw = jnp.dot(x_ref[...], w_ref[...], preferred_element_type=f32) + b_ref[...]
    sg = jax.nn.sigmoid(raw[:, SIG_BEGIN:SIG_END])                          # (TB, 42)

    def head_raw(name):
        off = _OFFS[name]
        return raw[:, off:off + _SIZE[name]]

    def head_sig(name):
        off = _OFFS[name] - SIG_BEGIN
        return sg[:, off:off + _SIZE[name]]

    wv_all   = head_raw("write_vector")                                    # (TB, WORD)
    er_all   = head_sig("erase_vector")
    wk_all   = head_sig("write_keys")
    fg_all   = head_sig("free_gate")                                       # (TB, R)
    ag_all   = head_sig("allocation_gate")                                 # (TB, 1)
    wg_all   = head_sig("write_gate")                                      # (TB, 1)
    beta_all = head_raw("write_strengths")                                 # (TB, 1) raw
    rm_all   = head_sig("read_mode")                                       # (TB, R*MODES)
    cm_all = jnp.concatenate(
        [rm_all[:, r * NUM_MODES + 2 * NUM_WRITES:r * NUM_MODES + 2 * NUM_WRITES + 1]
         for r in range(NUM_READS)], axis=1)                               # (TB, R)
    wgate_all = ag_all * wg_all
    knorm_all = jnp.sqrt(jnp.sum(wk_all * wk_all, axis=1, keepdims=True))

    sc_pieces = [fg_all, ag_all, wg_all, wgate_all, beta_all, knorm_all, cm_all]
    pad_w = WORD - (2 * NUM_READS + 5)
    if pad_w > 0:
        sc_pieces.append(jnp.zeros((raw.shape[0], pad_w), f32))
    scalars = jnp.concatenate(sc_pieces, axis=1)                           # (TB, WORD)
    heads_s[...] = jnp.concatenate([wv_all, er_all, wk_all, scalars], axis=1)

    steps = jnp.minimum(tb, t_total - c * tb)     # valid timesteps in this chunk

    carry0 = (mem_ref[0], rw_ref[0], ww_ref[0], prec_ref[0], usage_ref[...])

    # ---- the T-step recurrence (state carried in registers) ----
    def step(tt, carry):
        mem, prev_rw, prev_ww, prev_prec, prev_usage = carry

        row = heads_s[pl.ds(tt, 1), :]                                     # (1, 64)
        wv = row[:, SLAB_WV:SLAB_WV + WORD]
        er = row[:, SLAB_ER:SLAB_ER + WORD]
        wk = row[:, SLAB_WK:SLAB_WK + WORD]
        sc = row[:, SLAB_SC:SLAB_SC + WORD]
        ag    = sc[:, SC_AG:SC_AG + 1]
        wg    = sc[:, SC_WG:SC_WG + 1]
        wgate = sc[:, SC_WGT:SC_WGT + 1]
        beta  = sc[:, SC_BETA:SC_BETA + 1]
        knorm = sc[:, SC_KN:SC_KN + 1]

        # -- computeUsage --
        ww_prod = prev_ww[0:1, :]                                          # NUM_WRITES == 1
        usage = prev_usage + (1.0 - prev_usage) * (1.0 - ww_prod)
        fr_prod = ones_mem
        for r in range(NUM_READS):
            fg_r = sc[:, SC_FG + r:SC_FG + r + 1]
            fr_prod = fr_prod * (fg_r * prev_rw[r:r + 1, :])
        usage = usage * (1.0 - fr_prod)                                    # (1, M)

        # -- computeWrite_weights (NUM_WRITES == 1) --
        dot_i = lax.dot_general(wk, mem, (((1,), (1,)), ((), ())),
                                preferred_element_type=f32)                # (1, M)
        mem_sq = lax.dot_general(ones_word, mem * mem, (((1,), (1,)), ((), ())),
                                 preferred_element_type=f32)               # (1, M)
        # exact division, no eps — matches the reference (inf/NaN on zero norms too)
        sim = dot_i / (knorm * jnp.sqrt(mem_sq))
        cw = softmax_row(sim * beta)                                       # content weights
        alloc = allocation(usage)
        # the reference mutates `usage` in place, so the returned state reflects this
        usage = usage + (1.0 - usage) * wgate * alloc
        ww_row = wg * (ag * alloc + (1.0 - ag) * cw)                       # (1, M)
        ww_col = row_to_col(ww_row)                                        # (M, 1)

        # -- erase_and_write (reproduces the WORD==MEMORY broadcasting of the reference) --
        reset = 1.0 - ww_row * er                                          # (1, M)
        mem_new = mem * row_to_col(reset) + ww_col * wv                    # (M, WORD)

        # -- temporal linkage: link is identically zero for NUM_WRITES == 1
        #    (torch.diagonal(link).fill_(0) zeroes link[0,0,:,:]); precedence only.
        write_sum = jnp.sum(ww_row, axis=1, keepdims=True)                 # (1, 1)
        prec_new = (1.0 - write_sum) * prev_prec + ww_row                  # (1, M)

        # -- computeReadWeights: content weights == 1.0 (legacy softmax over the
        #    size-1 batch dim); forward/backward link weights are discarded by the
        #    reference, so read weights are the content-mode scalars broadcast.
        rw_new = jnp.concatenate(
            [sc[:, SC_CM + r:SC_CM + r + 1] * ones_mem for r in range(NUM_READS)],
            axis=0)                                                        # (R, M)

        # per-step read words, written into the chunk's resident output block
        rwords_ref[tt] = jnp.dot(rw_new, mem_new, preferred_element_type=f32)

        return (mem_new, rw_new, ww_row, prec_new, usage)

    mem_f, rw_f, ww_f, prec_f, usage_f = lax.fori_loop(0, steps, step, carry0)

    # spill the carried state once per chunk (written back to HBM at grid end)
    mem_ref[0]     = mem_f
    rw_ref[0]      = rw_f
    ww_ref[0]      = ww_f
    prec_ref[0]    = prec_f
    usage_ref[...] = usage_f


# --------------------------------- wrapper -----------------------------------
def memory_module_forward(x_seq, w_all, b_all, state, *, max_chunk=256):
    """Run the MemoryModule forward over a whole sequence in one fused kernel.

    x_seq : (T, HIDDEN)
    state = (memory, read_weights, write_weights, link, precedence, usage)
    returns (read_words (T, NUM_READS, WORD), new_state)
    """
    memory, read_weights, write_weights, link, precedence, usage = state

    T = int(x_seq.shape[0])
    if T == 0:
        # empty sequence: nothing to do, return the original state untouched
        return jnp.zeros((0, NUM_READS, WORD), jnp.float32), state
    del link  # never read: the reference zeroes the whole link every step (W == 1)

    # time-chunk size (multiple of 8 sublanes, capped for very short sequences)
    TB = max(8, min(max_chunk, 8 * ((T + 7) // 8)))
    num_chunks = (T + TB - 1) // TB
    T_pad = num_chunks * TB

    x2 = x_seq.astype(jnp.float32)
    if T_pad != T:
        x2 = jnp.concatenate(
            [x2, jnp.zeros((T_pad - T, HIDDEN), jnp.float32)], axis=0)

    # drop the dead read_keys / read_strengths columns; pad to a round lane count
    w_used = w_all[:, :USED].astype(jnp.float32)
    b_used = b_all[:, :USED].astype(jnp.float32)
    if USED_P != USED:
        w_used = jnp.concatenate(
            [w_used, jnp.zeros((HIDDEN, USED_P - USED), jnp.float32)], axis=1)
        b_used = jnp.concatenate(
            [b_used, jnp.zeros((1, USED_P - USED), jnp.float32)], axis=1)

    out_shapes = (
        jax.ShapeDtypeStruct((T_pad, NUM_READS, WORD), jnp.float32),       # read_words
        jax.ShapeDtypeStruct((1, MEMORY, WORD), jnp.float32),              # memory
        jax.ShapeDtypeStruct((1, NUM_READS, MEMORY), jnp.float32),         # read_weights
        jax.ShapeDtypeStruct((1, NUM_WRITES, MEMORY), jnp.float32),        # write_weights
        jax.ShapeDtypeStruct((1, NUM_WRITES, MEMORY), jnp.float32),        # precedence
        jax.ShapeDtypeStruct((1, MEMORY), jnp.float32),                    # usage
    )

    grid_spec = pltpu.PrefetchScalarGridSpec(
        num_scalar_prefetch=0,
        grid=(num_chunks,),
        in_specs=[
            pl.BlockSpec((TB, HIDDEN), lambda c: (c, 0)),                  # x chunk
            pl.BlockSpec((HIDDEN, USED_P), lambda c: (0, 0)),              # packed W
            pl.BlockSpec((1, USED_P), lambda c: (0, 0)),                   # packed b
            pl.BlockSpec((1, MEMORY, WORD), lambda c: (0, 0, 0)),          # memory0
            pl.BlockSpec((1, NUM_READS, MEMORY), lambda c: (0, 0, 0)),     # read_w0
            pl.BlockSpec((1, NUM_WRITES, MEMORY), lambda c: (0, 0, 0)),    # write_w0
            pl.BlockSpec((1, NUM_WRITES, MEMORY), lambda c: (0, 0, 0)),    # precedence0
            pl.BlockSpec((1, MEMORY), lambda c: (0, 0)),                   # usage0
        ],
        out_specs=[
            pl.BlockSpec((TB, NUM_READS, WORD), lambda c: (c, 0, 0)),      # read_words
            pl.BlockSpec((1, MEMORY, WORD), lambda c: (0, 0, 0)),
            pl.BlockSpec((1, NUM_READS, MEMORY), lambda c: (0, 0, 0)),
            pl.BlockSpec((1, NUM_WRITES, MEMORY), lambda c: (0, 0, 0)),
            pl.BlockSpec((1, NUM_WRITES, MEMORY), lambda c: (0, 0, 0)),
            pl.BlockSpec((1, MEMORY), lambda c: (0, 0)),
        ],
        scratch_shapes=[
            pltpu.VMEM((TB, SLAB_W), jnp.float32),        # per-chunk head slab
        ],
    )

    cost = pl.CostEstimate(
        flops=int(T) * (2 * HIDDEN * USED_P + 8 * MEMORY * WORD
                        + 2 * MEMORY * MEMORY + 4 * NUM_READS * MEMORY * WORD),
        transcendentals=int(T) * ((SIG_END - SIG_BEGIN) + 3 * MEMORY + 4),
        bytes_accessed=4 * (int(x2.size) + int(w_used.size) + int(b_used.size)
                            + T_pad * NUM_READS * WORD
                            + 2 * (MEMORY * WORD
                                   + (2 * NUM_WRITES + NUM_READS + 1) * MEMORY)),
    )

    kernel = functools.partial(_memory_kernel, t_total=T, tb=TB)

    outs = pl.pallas_call(
        kernel,
        out_shape=out_shapes,
        grid_spec=grid_spec,
        cost_estimate=cost,
        compiler_params=pltpu.CompilerParams(
            # Time axis is a recurrence -> sequential.  (On v7x, batches of
            # independent sequences would add a leading "parallel" axis to use
            # the second TensorCore; not applicable with batch_size == 1.)
            dimension_semantics=("arbitrary",)),
    )(x2, w_used, b_used, memory, read_weights, write_weights, precedence, usage)

    rwords_pad, mem_n, rw_n, ww_n, prec_n, usage_n = outs
    read_words = rwords_pad[:T]
    # link is statically zero for NUM_WRITES == 1 (see kernel comment)
    link_n = jnp.zeros((1, NUM_WRITES, MEMORY, MEMORY), jnp.float32)
    return read_words, (mem_n, rw_n, ww_n, link_n, prec_n, usage_n)


# ----------------------------------- main -------------------------------------
if __name__ == "__main__":
    key = jax.random.PRNGKey(0)
    keys = jax.random.split(key, 26)

    T = 8  # fused timesteps

    # deterministic nn.Linear-style init: U(-1/sqrt(fan_in), 1/sqrt(fan_in)),
    # all ten heads packed (the dead heads are kept for interface fidelity and
    # sliced off inside the wrapper).
    bound = 1.0 / math.sqrt(HIDDEN)
    ws, bs = [], []
    for i, (_, n) in enumerate(_ALL_SIZES):
        ws.append(jax.random.uniform(keys[i], (HIDDEN, n), jnp.float32, -bound, bound))
        bs.append(jax.random.uniform(keys[10 + i], (1, n), jnp.float32, -bound, bound))
    w_all = jnp.concatenate(ws, axis=1)           # (HIDDEN, TOTAL)
    b_all = jnp.concatenate(bs, axis=1)           # (1, TOTAL)

    x_seq = jax.random.normal(keys[20], (T, HIDDEN), jnp.float32)
    memory0 = 0.1 * jax.random.normal(keys[21], (1, MEMORY, WORD), jnp.float32)
    read_w0 = jax.random.uniform(keys[22], (1, NUM_READS, MEMORY), jnp.float32,
                                 0.0, 1.0 / MEMORY)
    write_w0 = jax.random.uniform(keys[23], (1, NUM_WRITES, MEMORY), jnp.float32,
                                  0.0, 1.0 / MEMORY)
    link0 = jnp.zeros((1, NUM_WRITES, MEMORY, MEMORY), jnp.float32)
    prec0 = jax.random.uniform(keys[24], (1, NUM_WRITES, MEMORY), jnp.float32,
                               0.0, 1.0 / MEMORY)
    usage0 = jax.random.uniform(keys[25], (1, MEMORY), jnp.float32, 0.0, 1.0)

    state = (memory0, read_w0, write_w0, link0, prec0, usage0)
    read_words, new_state = memory_module_forward(x_seq, w_all, b_all, state)
    (read_words, new_state) = jax.block_until_ready((read_words, new_state))

    mem_new, rw_new, ww_new, link_new, prec_new, usage_new = new_state
    assert read_words.shape == (T, NUM_READS, WORD)
    assert mem_new.shape == (1, MEMORY, WORD)
    assert rw_new.shape == (1, NUM_READS, MEMORY)
    assert ww_new.shape == (1, NUM_WRITES, MEMORY)
    assert link_new.shape == (1, NUM_WRITES, MEMORY, MEMORY)
    assert prec_new.shape == (1, NUM_WRITES, MEMORY)
    assert usage_new.shape == (1, MEMORY)
    assert bool(jnp.all(jnp.isfinite(read_words)))
    assert bool(jnp.all(jnp.isfinite(mem_new)))
    assert bool(jnp.all(jnp.isfinite(usage_new)))
    assert bool(jnp.all(link_new == 0.0))
    print("KERNEL_OK")
</pallas_src>

<mosaic_0001>
module attributes {stable_mosaic.version = 11 : i64} {
  func.func @_memory_kernel(%arg0: i32, %arg1: memref<8x32xf32, #tpu.memory_space<vmem>>, %arg2: memref<32x64xf32, #tpu.memory_space<vmem>>, %arg3: memref<1x64xf32, #tpu.memory_space<vmem>>, %arg4: memref<1x16x16xf32, #tpu.memory_space<vmem>>, %arg5: memref<1x2x16xf32, #tpu.memory_space<vmem>>, %arg6: memref<1x1x16xf32, #tpu.memory_space<vmem>>, %arg7: memref<1x1x16xf32, #tpu.memory_space<vmem>>, %arg8: memref<1x16xf32, #tpu.memory_space<vmem>>, %arg9: memref<8x2x16xf32, #tpu.memory_space<vmem>>, %arg10: memref<1x16x16xf32, #tpu.memory_space<vmem>>, %arg11: memref<1x2x16xf32, #tpu.memory_space<vmem>>, %arg12: memref<1x1x16xf32, #tpu.memory_space<vmem>>, %arg13: memref<1x1x16xf32, #tpu.memory_space<vmem>>, %arg14: memref<1x16xf32, #tpu.memory_space<vmem>>, %arg15: memref<8x64xf32, #tpu.memory_space<vmem>>) attributes {dimension_semantics = [#tpu.dimension_semantics<arbitrary>], iteration_bounds = array<i64: 1>, scalar_prefetch = 0 : i64, scratch_operands = 1 : i64, tpu.core_type = #tpu.core_type<tc>, window_params = [{transform_indices = @transform_0, window_bounds = array<i64: 8, 32>}, {pipeline_mode = #tpu.pipeline_mode<synchronous>, transform_indices = @transform_1, window_bounds = array<i64: 32, 64>}, {pipeline_mode = #tpu.pipeline_mode<synchronous>, transform_indices = @transform_2, window_bounds = array<i64: 1, 64>}, {pipeline_mode = #tpu.pipeline_mode<synchronous>, transform_indices = @transform_3, window_bounds = array<i64: 1, 16, 16>}, {pipeline_mode = #tpu.pipeline_mode<synchronous>, transform_indices = @transform_4, window_bounds = array<i64: 1, 2, 16>}, {pipeline_mode = #tpu.pipeline_mode<synchronous>, transform_indices = @transform_5, window_bounds = array<i64: 1, 1, 16>}, {pipeline_mode = #tpu.pipeline_mode<synchronous>, transform_indices = @transform_6, window_bounds = array<i64: 1, 1, 16>}, {pipeline_mode = #tpu.pipeline_mode<synchronous>, transform_indices = @transform_7, window_bounds = array<i64: 1, 16>}, {transform_indices = @transform_8, window_bounds = array<i64: 8, 2, 16>}, {pipeline_mode = #tpu.pipeline_mode<synchronous>, transform_indices = @transform_9, window_bounds = array<i64: 1, 16, 16>}, {pipeline_mode = #tpu.pipeline_mode<synchronous>, transform_indices = @transform_10, window_bounds = array<i64: 1, 2, 16>}, {pipeline_mode = #tpu.pipeline_mode<synchronous>, transform_indices = @transform_11, window_bounds = array<i64: 1, 1, 16>}, {pipeline_mode = #tpu.pipeline_mode<synchronous>, transform_indices = @transform_12, window_bounds = array<i64: 1, 1, 16>}, {pipeline_mode = #tpu.pipeline_mode<synchronous>, transform_indices = @transform_13, window_bounds = array<i64: 1, 16>}]} {
    %0 = tpu.iota {dimensions = array<i32: 0>} : vector<16x16xi32>
    %1 = tpu.iota {dimensions = array<i32: 1>} : vector<16x16xi32>
    %2 = arith.cmpi eq, %0, %1 : vector<16x16xi32>
    %3 = arith.extui %2 : vector<16x16xi1> to vector<16x16xi32>
    %4 = arith.sitofp %3 : vector<16x16xi32> to vector<16x16xf32>
    %cst = arith.constant 1.000000e+00 : f32
    %5 = vector.broadcast %cst : f32 to vector<1x16xf32>
    %cst_0 = arith.constant 1.000000e+00 : f32
    %6 = vector.broadcast %cst_0 : f32 to vector<1x16xf32>
    %c0_i32 = arith.constant 0 : i32
    %7 = arith.cmpi eq, %arg0, %c0_i32 : i32
    %8 = arith.extui %7 : i1 to i32
    %c0_i32_1 = arith.constant 0 : i32
    %9 = arith.cmpi ne, %8, %c0_i32_1 : i32
    scf.if %9 {
      %c0_44 = arith.constant 0 : index
      %c0_45 = arith.constant 0 : index
      %c0_46 = arith.constant 0 : index
      %70 = vector.load %arg4[%c0_44, %c0_45, %c0_46] : memref<1x16x16xf32, #tpu.memory_space<vmem>>, vector<1x16x16xf32>
      %71 = vector.shape_cast %70 : vector<1x16x16xf32> to vector<16x16xf32>
      %c0_47 = arith.constant 0 : index
      %c0_48 = arith.constant 0 : index
      %c0_49 = arith.constant 0 : index
      %72 = vector.load %arg10[%c0_47, %c0_48, %c0_49] : memref<1x16x16xf32, #tpu.memory_space<vmem>>, vector<1x16x16xf32>
      %73 = vector.shape_cast %72 : vector<1x16x16xf32> to vector<16x16xf32>
      %74 = vector.shape_cast %71 : vector<16x16xf32> to vector<1x16x16xf32>
      tpu.vector_store %arg10[%c0_47, %c0_48, %c0_49], %74 {strides = array<i32>} : memref<1x16x16xf32, #tpu.memory_space<vmem>>, vector<1x16x16xf32>,
      %c0_50 = arith.constant 0 : index
      %c0_51 = arith.constant 0 : index
      %c0_52 = arith.constant 0 : index
      %75 = vector.load %arg5[%c0_50, %c0_51, %c0_52] : memref<1x2x16xf32, #tpu.memory_space<vmem>>, vector<1x2x16xf32>
      %76 = vector.shape_cast %75 : vector<1x2x16xf32> to vector<2x16xf32>
      %c0_53 = arith.constant 0 : index
      %c0_54 = arith.constant 0 : index
      %c0_55 = arith.constant 0 : index
      %77 = vector.load %arg11[%c0_53, %c0_54, %c0_55] : memref<1x2x16xf32, #tpu.memory_space<vmem>>, vector<1x2x16xf32>
      %78 = vector.shape_cast %77 : vector<1x2x16xf32> to vector<2x16xf32>
      %79 = vector.shape_cast %76 : vector<2x16xf32> to vector<1x2x16xf32>
      tpu.vector_store %arg11[%c0_53, %c0_54, %c0_55], %79 {strides = array<i32>} : memref<1x2x16xf32, #tpu.memory_space<vmem>>, vector<1x2x16xf32>,
      %c0_56 = arith.constant 0 : index
      %c0_57 = arith.constant 0 : index
      %c0_58 = arith.constant 0 : index
      %80 = vector.load %arg6[%c0_56, %c0_57, %c0_58] : memref<1x1x16xf32, #tpu.memory_space<vmem>>, vector<1x1x16xf32>
      %81 = vector.shape_cast %80 : vector<1x1x16xf32> to vector<1x16xf32>
      %c0_59 = arith.constant 0 : index
      %c0_60 = arith.constant 0 : index
      %c0_61 = arith.constant 0 : index
      %82 = vector.load %arg12[%c0_59, %c0_60, %c0_61] : memref<1x1x16xf32, #tpu.memory_space<vmem>>, vector<1x1x16xf32>
      %83 = vector.shape_cast %82 : vector<1x1x16xf32> to vector<1x16xf32>
      %84 = vector.shape_cast %81 : vector<1x16xf32> to vector<1x1x16xf32>
      tpu.vector_store %arg12[%c0_59, %c0_60, %c0_61], %84 {strides = array<i32>} : memref<1x1x16xf32, #tpu.memory_space<vmem>>, vector<1x1x16xf32>,
      %c0_62 = arith.constant 0 : index
      %c0_63 = arith.constant 0 : index
      %c0_64 = arith.constant 0 : index
      %85 = vector.load %arg7[%c0_62, %c0_63, %c0_64] : memref<1x1x16xf32, #tpu.memory_space<vmem>>, vector<1x1x16xf32>
      %86 = vector.shape_cast %85 : vector<1x1x16xf32> to vector<1x16xf32>
      %c0_65 = arith.constant 0 : index
      %c0_66 = arith.constant 0 : index
      %c0_67 = arith.constant 0 : index
      %87 = vector.load %arg13[%c0_65, %c0_66, %c0_67] : memref<1x1x16xf32, #tpu.memory_space<vmem>>, vector<1x1x16xf32>
      %88 = vector.shape_cast %87 : vector<1x1x16xf32> to vector<1x16xf32>
      %89 = vector.shape_cast %86 : vector<1x16xf32> to vector<1x1x16xf32>
      tpu.vector_store %arg13[%c0_65, %c0_66, %c0_67], %89 {strides = array<i32>} : memref<1x1x16xf32, #tpu.memory_space<vmem>>, vector<1x1x16xf32>,
      %c0_68 = arith.constant 0 : index
      %c0_69 = arith.constant 0 : index
      %90 = vector.load %arg8[%c0_68, %c0_69] : memref<1x16xf32, #tpu.memory_space<vmem>>, vector<1x16xf32>
      %c0_70 = arith.constant 0 : index
      %c0_71 = arith.constant 0 : index
      %91 = vector.load %arg14[%c0_70, %c0_71] : memref<1x16xf32, #tpu.memory_space<vmem>>, vector<1x16xf32>
      tpu.vector_store %arg14[%c0_70, %c0_71], %90 {strides = array<i32>} : memref<1x16xf32, #tpu.memory_space<vmem>>, vector<1x16xf32>,
    } else {
    }
    %c0 = arith.constant 0 : index
    %c0_2 = arith.constant 0 : index
    %10 = vector.load %arg1[%c0, %c0_2] : memref<8x32xf32, #tpu.memory_space<vmem>>, vector<8x32xf32>
    %c0_3 = arith.constant 0 : index
    %c0_4 = arith.constant 0 : index
    %11 = vector.load %arg2[%c0_3, %c0_4] : memref<32x64xf32, #tpu.memory_space<vmem>>, vector<32x64xf32>
    %cst_5 = arith.constant dense<0.000000e+00> : vector<8x64xf32>
    %12 = tpu.matmul %10, %11, %cst_5 {dimension_numbers = #tpu.dot_dimension_numbers<[1], [0], [0], [1], [0, 0, 1, 1], [], []>} : vector<8x32xf32>, vector<32x64xf32>, vector<8x64xf32> -> vector<8x64xf32>
    %c0_6 = arith.constant 0 : index
    %c0_7 = arith.constant 0 : index
    %13 = vector.load %arg3[%c0_6, %c0_7] : memref<1x64xf32, #tpu.memory_space<vmem>>, vector<1x64xf32>
    %14 = vector.broadcast %13 : vector<1x64xf32> to vector<8x64xf32>
    %15 = arith.addf %12, %14 : vector<8x64xf32>
    %16 = vector.extract_strided_slice %15 {offsets = [0, 16], sizes = [8, 42], strides = [1, 1]} : vector<8x64xf32> to vector<8x42xf32>
    %17 = arith.negf %16 : vector<8x42xf32>
    %18 = math.exp %17 : vector<8x42xf32>
    %cst_8 = arith.constant 1.000000e+00 : f32
    %19 = vector.broadcast %cst_8 : f32 to vector<8x42xf32>
    %20 = arith.addf %19, %18 : vector<8x42xf32>
    %21 = arith.divf %19, %20 : vector<8x42xf32>
    %22 = vector.extract_strided_slice %15 {offsets = [0, 0], sizes = [8, 16], strides = [1, 1]} : vector<8x64xf32> to vector<8x16xf32>
    %23 = vector.extract_strided_slice %21 {offsets = [0, 0], sizes = [8, 16], strides = [1, 1]} : vector<8x42xf32> to vector<8x16xf32>
    %24 = vector.extract_strided_slice %21 {offsets = [0, 26], sizes = [8, 16], strides = [1, 1]} : vector<8x42xf32> to vector<8x16xf32>
    %25 = vector.extract_strided_slice %21 {offsets = [0, 16], sizes = [8, 2], strides = [1, 1]} : vector<8x42xf32> to vector<8x2xf32>
    %26 = vector.extract_strided_slice %21 {offsets = [0, 18], sizes = [8, 1], strides = [1, 1]} : vector<8x42xf32> to vector<8x1xf32>
    %27 = vector.extract_strided_slice %21 {offsets = [0, 19], sizes = [8, 1], strides = [1, 1]} : vector<8x42xf32> to vector<8x1xf32>
    %28 = vector.extract_strided_slice %15 {offsets = [0, 58], sizes = [8, 1], strides = [1, 1]} : vector<8x64xf32> to vector<8x1xf32>
    %29 = vector.extract_strided_slice %21 {offsets = [0, 20], sizes = [8, 6], strides = [1, 1]} : vector<8x42xf32> to vector<8x6xf32>
    %30 = vector.extract_strided_slice %29 {offsets = [0, 2], sizes = [8, 1], strides = [1, 1]} : vector<8x6xf32> to vector<8x1xf32>
    %31 = vector.extract_strided_slice %29 {offsets = [0, 5], sizes = [8, 1], strides = [1, 1]} : vector<8x6xf32> to vector<8x1xf32>
    %32 = tpu.concatenate %30, %31 in 1 : vector<8x1xf32>, vector<8x1xf32> -> vector<8x2xf32>
    %33 = arith.mulf %26, %27 : vector<8x1xf32>
    %34 = arith.mulf %24, %24 : vector<8x16xf32>
    %cst_9 = arith.constant dense<0.000000e+00> : vector<8xf32>
    %35 = vector.multi_reduction <add>, %34, %cst_9 [1] : vector<8x16xf32> to vector<8xf32>
    %36 = vector.shape_cast %35 : vector<8xf32> to vector<8x1xf32>
    %37 = math.sqrt %36 : vector<8x1xf32>
    %cst_10 = arith.constant 0.000000e+00 : f32
    %38 = vector.broadcast %cst_10 : f32 to vector<8x7xf32>
    %39 = tpu.concatenate %25, %26, %27, %33, %28, %37, %32, %38 in 1 : vector<8x2xf32>, vector<8x1xf32>, vector<8x1xf32>, vector<8x1xf32>, vector<8x1xf32>, vector<8x1xf32>, vector<8x2xf32>, vector<8x7xf32> -> vector<8x16xf32>
    %40 = tpu.concatenate %22, %23, %24, %39 in 1 : vector<8x16xf32>, vector<8x16xf32>, vector<8x16xf32>, vector<8x16xf32> -> vector<8x64xf32>
    %c0_11 = arith.constant 0 : index
    %c0_12 = arith.constant 0 : index
    %41 = vector.load %arg15[%c0_11, %c0_12] : memref<8x64xf32, #tpu.memory_space<vmem>>, vector<8x64xf32>
    tpu.vector_store %arg15[%c0_11, %c0_12], %40 {strides = array<i32>} : memref<8x64xf32, #tpu.memory_space<vmem>>, vector<8x64xf32>,
    %c8_i32 = arith.constant 8 : i32
    %42 = arith.muli %arg0, %c8_i32 : i32
    %c8_i32_13 = arith.constant 8 : i32
    %43 = arith.subi %c8_i32_13, %42 : i32
    %c8_i32_14 = arith.constant 8 : i32
    %44 = arith.minsi %c8_i32_14, %43 : i32
    %c0_15 = arith.constant 0 : index
    %c0_16 = arith.constant 0 : index
    %c0_17 = arith.constant 0 : index
    %45 = vector.load %arg10[%c0_15, %c0_16, %c0_17] : memref<1x16x16xf32, #tpu.memory_space<vmem>>, vector<1x16x16xf32>
    %46 = vector.shape_cast %45 : vector<1x16x16xf32> to vector<16x16xf32>
    %c0_18 = arith.constant 0 : index
    %c0_19 = arith.constant 0 : index
    %c0_20 = arith.constant 0 : index
    %47 = vector.load %arg11[%c0_18, %c0_19, %c0_20] : memref<1x2x16xf32, #tpu.memory_space<vmem>>, vector<1x2x16xf32>
    %48 = vector.shape_cast %47 : vector<1x2x16xf32> to vector<2x16xf32>
    %c0_21 = arith.constant 0 : index
    %c0_22 = arith.constant 0 : index
    %c0_23 = arith.constant 0 : index
    %49 = vector.load %arg12[%c0_21, %c0_22, %c0_23] : memref<1x1x16xf32, #tpu.memory_space<vmem>>, vector<1x1x16xf32>
    %50 = vector.shape_cast %49 : vector<1x1x16xf32> to vector<1x16xf32>
    %c0_24 = arith.constant 0 : index
    %c0_25 = arith.constant 0 : index
    %c0_26 = arith.constant 0 : index
    %51 = vector.load %arg13[%c0_24, %c0_25, %c0_26] : memref<1x1x16xf32, #tpu.memory_space<vmem>>, vector<1x1x16xf32>
    %52 = vector.shape_cast %51 : vector<1x1x16xf32> to vector<1x16xf32>
    %c0_27 = arith.constant 0 : index
    %c0_28 = arith.constant 0 : index
    %53 = vector.load %arg14[%c0_27, %c0_28] : memref<1x16xf32, #tpu.memory_space<vmem>>, vector<1x16xf32>
    %c0_i32_29 = arith.constant 0 : i32
    %54 = arith.subi %44, %c0_i32_29 : i32
    %55 = arith.addi %c0_i32_29, %54 : i32
    %c1_i32 = arith.constant 1 : i32
    %56:5 = scf.for %arg16 = %c0_i32_29 to %55 step %c1_i32 iter_args(%arg17 = %46, %arg18 = %48, %arg19 = %50, %arg20 = %52, %arg21 = %53) -> (vector<16x16xf32>, vector<2x16xf32>, vector<1x16xf32>, vector<1x16xf32>, vector<1x16xf32>)  : i32 {
      %70 = arith.index_cast %arg16 : i32 to index
      %c0_44 = arith.constant 0 : index
      %71 = vector.load %arg15[%70, %c0_44] : memref<8x64xf32, #tpu.memory_space<vmem>>, vector<1x64xf32>
      %72 = vector.extract_strided_slice %71 {offsets = [0, 0], sizes = [1, 16], strides = [1, 1]} : vector<1x64xf32> to vector<1x16xf32>
      %73 = vector.extract_strided_slice %71 {offsets = [0, 16], sizes = [1, 16], strides = [1, 1]} : vector<1x64xf32> to vector<1x16xf32>
      %74 = vector.extract_strided_slice %71 {offsets = [0, 32], sizes = [1, 16], strides = [1, 1]} : vector<1x64xf32> to vector<1x16xf32>
      %75 = vector.extract_strided_slice %71 {offsets = [0, 48], sizes = [1, 16], strides = [1, 1]} : vector<1x64xf32> to vector<1x16xf32>
      %76 = vector.extract_strided_slice %75 {offsets = [0, 2], sizes = [1, 1], strides = [1, 1]} : vector<1x16xf32> to vector<1x1xf32>
      %77 = vector.extract_strided_slice %75 {offsets = [0, 3], sizes = [1, 1], strides = [1, 1]} : vector<1x16xf32> to vector<1x1xf32>
      %78 = vector.extract_strided_slice %75 {offsets = [0, 4], sizes = [1, 1], strides = [1, 1]} : vector<1x16xf32> to vector<1x1xf32>
      %79 = vector.extract_strided_slice %75 {offsets = [0, 5], sizes = [1, 1], strides = [1, 1]} : vector<1x16xf32> to vector<1x1xf32>
      %80 = vector.extract_strided_slice %75 {offsets = [0, 6], sizes = [1, 1], strides = [1, 1]} : vector<1x16xf32> to vector<1x1xf32>
      %cst_45 = arith.constant 1.000000e+00 : f32
      %81 = vector.broadcast %cst_45 : f32 to vector<1x16xf32>
      %82 = arith.subf %81, %arg21 : vector<1x16xf32>
      %cst_46 = arith.constant 1.000000e+00 : f32
      %83 = vector.broadcast %cst_46 : f32 to vector<1x16xf32>
      %84 = arith.subf %83, %arg19 : vector<1x16xf32>
      %85 = arith.mulf %82, %84 : vector<1x16xf32>
      %86 = arith.addf %arg21, %85 : vector<1x16xf32>
      %87 = vector.extract_strided_slice %75 {offsets = [0, 0], sizes = [1, 1], strides = [1, 1]} : vector<1x16xf32> to vector<1x1xf32>
      %88 = vector.extract_strided_slice %arg18 {offsets = [0, 0], sizes = [1, 16], strides = [1, 1]} : vector<2x16xf32> to vector<1x16xf32>
      %89 = vector.broadcast %87 : vector<1x1xf32> to vector<1x16xf32>
      %90 = arith.mulf %89, %88 : vector<1x16xf32>
      %91 = arith.mulf %6, %90 : vector<1x16xf32>
      %92 = vector.extract_strided_slice %75 {offsets = [0, 1], sizes = [1, 1], strides = [1, 1]} : vector<1x16xf32> to vector<1x1xf32>
      %93 = vector.extract_strided_slice %arg18 {offsets = [1, 0], sizes = [1, 16], strides = [1, 1]} : vector<2x16xf32> to vector<1x16xf32>
      %94 = vector.broadcast %92 : vector<1x1xf32> to vector<1x16xf32>
      %95 = arith.mulf %94, %93 : vector<1x16xf32>
      %96 = arith.mulf %91, %95 : vector<1x16xf32>
      %cst_47 = arith.constant 1.000000e+00 : f32
      %97 = vector.broadcast %cst_47 : f32 to vector<1x16xf32>
      %98 = arith.subf %97, %96 : vector<1x16xf32>
      %99 = arith.mulf %86, %98 : vector<1x16xf32>
      %cst_48 = arith.constant dense<0.000000e+00> : vector<1x16xf32>
      %100 = tpu.matmul %74, %arg17, %cst_48 {dimension_numbers = #tpu.dot_dimension_numbers<[1], [1], [0], [0], [0, 0, 1, 0], [], []>} : vector<1x16xf32>, vector<16x16xf32>, vector<1x16xf32> -> vector<1x16xf32>
      %101 = arith.mulf %arg17, %arg17 : vector<16x16xf32>
      %cst_49 = arith.constant dense<0.000000e+00> : vector<1x16xf32>
      %102 = tpu.matmul %5, %101, %cst_49 {dimension_numbers = #tpu.dot_dimension_numbers<[1], [1], [0], [0], [0, 0, 1, 0], [], []>} : vector<1x16xf32>, vector<16x16xf32>, vector<1x16xf32> -> vector<1x16xf32>
      %103 = math.sqrt %102 : vector<1x16xf32>
      %104 = vector.broadcast %80 : vector<1x1xf32> to vector<1x16xf32>
      %105 = arith.mulf %104, %103 : vector<1x16xf32>
      %106 = arith.divf %100, %105 : vector<1x16xf32>
      %107 = vector.broadcast %79 : vector<1x1xf32> to vector<1x16xf32>
      %108 = arith.mulf %106, %107 : vector<1x16xf32>
      %cst_50 = arith.constant dense<0xFF800000> : vector<1xf32>
      %109 = vector.multi_reduction <maximumf>, %108, %cst_50 [1] : vector<1x16xf32> to vector<1xf32>
      %110 = vector.shape_cast %109 : vector<1xf32> to vector<1x1xf32>
      %111 = vector.broadcast %110 : vector<1x1xf32> to vector<1x16xf32>
      %112 = arith.subf %108, %111 : vector<1x16xf32>
      %113 = math.exp %112 : vector<1x16xf32>
      %cst_51 = arith.constant dense<0.000000e+00> : vector<1xf32>
      %114 = vector.multi_reduction <add>, %113, %cst_51 [1] : vector<1x16xf32> to vector<1xf32>
      %115 = vector.shape_cast %114 : vector<1xf32> to vector<1x1xf32>
      %116 = vector.broadcast %115 : vector<1x1xf32> to vector<1x16xf32>
      %117 = arith.divf %113, %116 : vector<1x16xf32>
      %cst_52 = arith.constant 9.990000e-01 : f32
      %118 = vector.broadcast %cst_52 : f32 to vector<1x16xf32>
      %119 = arith.mulf %118, %99 : vector<1x16xf32>
      %cst_53 = arith.constant 1.000000e-03 : f32
      %120 = vector.broadcast %cst_53 : f32 to vector<1x16xf32>
      %121 = arith.addf %120, %119 : vector<1x16xf32>
      %122 = vector.broadcast %121 : vector<1x16xf32> to vector<16x16xf32>
      %123 = arith.mulf %4, %122 : vector<16x16xf32>
      %cst_54 = arith.constant dense<0.000000e+00> : vector<16xf32>
      %124 = vector.multi_reduction <add>, %123, %cst_54 [1] : vector<16x16xf32> to vector<16xf32>
      %125 = vector.shape_cast %124 : vector<16xf32> to vector<16x1xf32>
      %126 = vector.broadcast %121 : vector<1x16xf32> to vector<16x16xf32>
      %127 = vector.broadcast %125 : vector<16x1xf32> to vector<16x16xf32>
      %128 = arith.cmpf olt, %126, %127 : vector<16x16xf32>
      %129 = vector.broadcast %121 : vector<1x16xf32> to vector<16x16xf32>
      %130 = vector.broadcast %125 : vector<16x1xf32> to vector<16x16xf32>
      %131 = arith.cmpf oeq, %129, %130 : vector<16x16xf32>
      %132 = arith.cmpi slt, %1, %0 : vector<16x16xi32>
      %133 = arith.andi %131, %132 : vector<16x16xi1>
      %134 = arith.ori %128, %133 : vector<16x16xi1>
      %135 = arith.extui %134 : vector<16x16xi1> to vector<16x16xi32>
      %136 = arith.sitofp %135 : vector<16x16xi32> to vector<16x16xf32>
      %137 = math.log %121 : vector<1x16xf32>
      %cst_55 = arith.constant dense<0.000000e+00> : vector<1x16xf32>
      %138 = tpu.matmul %137, %136, %cst_55 {dimension_numbers = #tpu.dot_dimension_numbers<[1], [1], [0], [0], [0, 0, 1, 0], [], []>} : vector<1x16xf32>, vector<16x16xf32>, vector<1x16xf32> -> vector<1x16xf32>
      %139 = math.exp %138 : vector<1x16xf32>
      %cst_56 = arith.constant 1.000000e+00 : f32
      %140 = vector.broadcast %cst_56 : f32 to vector<1x16xf32>
      %141 = arith.subf %140, %121 : vector<1x16xf32>
      %142 = arith.mulf %141, %139 : vector<1x16xf32>
      %cst_57 = arith.constant 1.000000e+00 : f32
      %143 = vector.broadcast %cst_57 : f32 to vector<1x16xf32>
      %144 = arith.subf %143, %99 : vector<1x16xf32>
      %145 = vector.broadcast %78 : vector<1x1xf32> to vector<1x16xf32>
      %146 = arith.mulf %144, %145 : vector<1x16xf32>
      %147 = arith.mulf %146, %142 : vector<1x16xf32>
      %148 = arith.addf %99, %147 : vector<1x16xf32>
      %149 = vector.broadcast %76 : vector<1x1xf32> to vector<1x16xf32>
      %150 = arith.mulf %149, %142 : vector<1x16xf32>
      %cst_58 = arith.constant 1.000000e+00 : f32
      %151 = vector.broadcast %cst_58 : f32 to vector<1x1xf32>
      %152 = arith.subf %151, %76 : vector<1x1xf32>
      %153 = vector.broadcast %152 : vector<1x1xf32> to vector<1x16xf32>
      %154 = arith.mulf %153, %117 : vector<1x16xf32>
      %155 = arith.addf %150, %154 : vector<1x16xf32>
      %156 = vector.broadcast %77 : vector<1x1xf32> to vector<1x16xf32>
      %157 = arith.mulf %156, %155 : vector<1x16xf32>
      %158 = vector.broadcast %157 : vector<1x16xf32> to vector<16x16xf32>
      %159 = arith.mulf %4, %158 : vector<16x16xf32>
      %cst_59 = arith.constant dense<0.000000e+00> : vector<16xf32>
      %160 = vector.multi_reduction <add>, %159, %cst_59 [1] : vector<16x16xf32> to vector<16xf32>
      %161 = vector.shape_cast %160 : vector<16xf32> to vector<16x1xf32>
      %162 = arith.mulf %157, %73 : vector<1x16xf32>
      %cst_60 = arith.constant 1.000000e+00 : f32
      %163 = vector.broadcast %cst_60 : f32 to vector<1x16xf32>
      %164 = arith.subf %163, %162 : vector<1x16xf32>
      %165 = vector.broadcast %164 : vector<1x16xf32> to vector<16x16xf32>
      %166 = arith.mulf %4, %165 : vector<16x16xf32>
      %cst_61 = arith.constant dense<0.000000e+00> : vector<16xf32>
      %167 = vector.multi_reduction <add>, %166, %cst_61 [1] : vector<16x16xf32> to vector<16xf32>
      %168 = vector.shape_cast %167 : vector<16xf32> to vector<16x1xf32>
      %169 = vector.broadcast %168 : vector<16x1xf32> to vector<16x16xf32>
      %170 = arith.mulf %arg17, %169 : vector<16x16xf32>
      %171 = vector.broadcast %161 : vector<16x1xf32> to vector<16x16xf32>
      %172 = vector.broadcast %72 : vector<1x16xf32> to vector<16x16xf32>
      %173 = arith.mulf %171, %172 : vector<16x16xf32>
      %174 = arith.addf %170, %173 : vector<16x16xf32>
      %cst_62 = arith.constant dense<0.000000e+00> : vector<1xf32>
      %175 = vector.multi_reduction <add>, %157, %cst_62 [1] : vector<1x16xf32> to vector<1xf32>
      %176 = vector.shape_cast %175 : vector<1xf32> to vector<1x1xf32>
      %cst_63 = arith.constant 1.000000e+00 : f32
      %177 = vector.broadcast %cst_63 : f32 to vector<1x1xf32>
      %178 = arith.subf %177, %176 : vector<1x1xf32>
      %179 = vector.broadcast %178 : vector<1x1xf32> to vector<1x16xf32>
      %180 = arith.mulf %179, %arg20 : vector<1x16xf32>
      %181 = arith.addf %180, %157 : vector<1x16xf32>
      %182 = vector.extract_strided_slice %75 {offsets = [0, 7], sizes = [1, 1], strides = [1, 1]} : vector<1x16xf32> to vector<1x1xf32>
      %183 = vector.broadcast %182 : vector<1x1xf32> to vector<1x16xf32>
      %184 = arith.mulf %183, %6 : vector<1x16xf32>
      %185 = vector.extract_strided_slice %75 {offsets = [0, 8], sizes = [1, 1], strides = [1, 1]} : vector<1x16xf32> to vector<1x1xf32>
      %186 = vector.broadcast %185 : vector<1x1xf32> to vector<1x16xf32>
      %187 = arith.mulf %186, %6 : vector<1x16xf32>
      %188 = tpu.concatenate %184, %187 in 0 : vector<1x16xf32>, vector<1x16xf32> -> vector<2x16xf32>
      %cst_64 = arith.constant dense<0.000000e+00> : vector<2x16xf32>
      %189 = tpu.matmul %188, %174, %cst_64 {dimension_numbers = #tpu.dot_dimension_numbers<[1], [0], [0], [1], [0, 0, 1, 1], [], []>} : vector<2x16xf32>, vector<16x16xf32>, vector<2x16xf32> -> vector<2x16xf32>
      %190 = arith.index_cast %arg16 : i32 to index
      %c0_65 = arith.constant 0 : index
      %c0_66 = arith.constant 0 : index
      %191 = vector.load %arg9[%190, %c0_65, %c0_66] : memref<8x2x16xf32, #tpu.memory_space<vmem>>, vector<1x2x16xf32>
      %192 = vector.shape_cast %191 : vector<1x2x16xf32> to vector<2x16xf32>
      %193 = vector.shape_cast %189 : vector<2x16xf32> to vector<1x2x16xf32>
      tpu.vector_store %arg9[%190, %c0_65, %c0_66], %193 {strides = array<i32>} : memref<8x2x16xf32, #tpu.memory_space<vmem>>, vector<1x2x16xf32>,
      scf.yield %174, %188, %157, %181, %148 : vector<16x16xf32>, vector<2x16xf32>, vector<1x16xf32>, vector<1x16xf32>, vector<1x16xf32>
    }
    %c0_30 = arith.constant 0 : index
    %c0_31 = arith.constant 0 : index
    %c0_32 = arith.constant 0 : index
    %57 = vector.load %arg10[%c0_30, %c0_31, %c0_32] : memref<1x16x16xf32, #tpu.memory_space<vmem>>, vector<1x16x16xf32>
    %58 = vector.shape_cast %57 : vector<1x16x16xf32> to vector<16x16xf32>
    %59 = vector.shape_cast %56#0 : vector<16x16xf32> to vector<1x16x16xf32>
    tpu.vector_store %arg10[%c0_30, %c0_31, %c0_32], %59 {strides = array<i32>} : memref<1x16x16xf32, #tpu.memory_space<vmem>>, vector<1x16x16xf32>,
    %c0_33 = arith.constant 0 : index
    %c0_34 = arith.constant 0 : index
    %c0_35 = arith.constant 0 : index
    %60 = vector.load %arg11[%c0_33, %c0_34, %c0_35] : memref<1x2x16xf32, #tpu.memory_space<vmem>>, vector<1x2x16xf32>
    %61 = vector.shape_cast %60 : vector<1x2x16xf32> to vector<2x16xf32>
    %62 = vector.shape_cast %56#1 : vector<2x16xf32> to vector<1x2x16xf32>
    tpu.vector_store %arg11[%c0_33, %c0_34, %c0_35], %62 {strides = array<i32>} : memref<1x2x16xf32, #tpu.memory_space<vmem>>, vector<1x2x16xf32>,
    %c0_36 = arith.constant 0 : index
    %c0_37 = arith.constant 0 : index
    %c0_38 = arith.constant 0 : index
    %63 = vector.load %arg12[%c0_36, %c0_37, %c0_38] : memref<1x1x16xf32, #tpu.memory_space<vmem>>, vector<1x1x16xf32>
    %64 = vector.shape_cast %63 : vector<1x1x16xf32> to vector<1x16xf32>
    %65 = vector.shape_cast %56#2 : vector<1x16xf32> to vector<1x1x16xf32>
    tpu.vector_store %arg12[%c0_36, %c0_37, %c0_38], %65 {strides = array<i32>} : memref<1x1x16xf32, #tpu.memory_space<vmem>>, vector<1x1x16xf32>,
    %c0_39 = arith.constant 0 : index
    %c0_40 = arith.constant 0 : index
    %c0_41 = arith.constant 0 : index
    %66 = vector.load %arg13[%c0_39, %c0_40, %c0_41] : memref<1x1x16xf32, #tpu.memory_space<vmem>>, vector<1x1x16xf32>
    %67 = vector.shape_cast %66 : vector<1x1x16xf32> to vector<1x16xf32>
    %68 = vector.shape_cast %56#3 : vector<1x16xf32> to vector<1x1x16xf32>
    tpu.vector_store %arg13[%c0_39, %c0_40, %c0_41], %68 {strides = array<i32>} : memref<1x1x16xf32, #tpu.memory_space<vmem>>, vector<1x1x16xf32>,
    %c0_42 = arith.constant 0 : index
    %c0_43 = arith.constant 0 : index
    %69 = vector.load %arg14[%c0_42, %c0_43] : memref<1x16xf32, #tpu.memory_space<vmem>>, vector<1x16xf32>
    tpu.vector_store %arg14[%c0_42, %c0_43], %56#4 {strides = array<i32>} : memref<1x16xf32, #tpu.memory_space<vmem>>, vector<1x16xf32>,
    return
  }
  func.func @transform_0(%arg0: i32) -> (i32, i32) {
    %c0_i32 = arith.constant 0 : i32
    %c0_i32_0 = arith.constant 0 : i32
    return %arg0, %c0_i32 : i32, i32
  }
  func.func @transform_1(%arg0: i32) -> (i32, i32) {
    %c0_i32 = arith.constant 0 : i32
    %c0_i32_0 = arith.constant 0 : i32
    %c0_i32_1 = arith.constant 0 : i32
    return %c0_i32, %c0_i32_0 : i32, i32
  }
  func.func @transform_2(%arg0: i32) -> (i32, i32) {
    %c0_i32 = arith.constant 0 : i32
    %c0_i32_0 = arith.constant 0 : i32
    %c0_i32_1 = arith.constant 0 : i32
    return %c0_i32, %c0_i32_0 : i32, i32
  }
  func.func @transform_3(%arg0: i32) -> (i32, i32, i32) {
    %c0_i32 = arith.constant 0 : i32
    %c0_i32_0 = arith.constant 0 : i32
    %c0_i32_1 = arith.constant 0 : i32
    %c0_i32_2 = arith.constant 0 : i32
    return %c0_i32, %c0_i32_0, %c0_i32_1 : i32, i32, i32
  }
  func.func @transform_4(%arg0: i32) -> (i32, i32, i32) {
    %c0_i32 = arith.constant 0 : i32
    %c0_i32_0 = arith.constant 0 : i32
    %c0_i32_1 = arith.constant 0 : i32
    %c0_i32_2 = arith.constant 0 : i32
    return %c0_i32, %c0_i32_0, %c0_i32_1 : i32, i32, i32
  }
  func.func @transform_5(%arg0: i32) -> (i32, i32, i32) {
    %c0_i32 = arith.constant 0 : i32
    %c0_i32_0 = arith.constant 0 : i32
    %c0_i32_1 = arith.constant 0 : i32
    %c0_i32_2 = arith.constant 0 : i32
    return %c0_i32, %c0_i32_0, %c0_i32_1 : i32, i32, i32
  }
  func.func @transform_6(%arg0: i32) -> (i32, i32, i32) {
    %c0_i32 = arith.constant 0 : i32
    %c0_i32_0 = arith.constant 0 : i32
    %c0_i32_1 = arith.constant 0 : i32
    %c0_i32_2 = arith.constant 0 : i32
    return %c0_i32, %c0_i32_0, %c0_i32_1 : i32, i32, i32
  }
  func.func @transform_7(%arg0: i32) -> (i32, i32) {
    %c0_i32 = arith.constant 0 : i32
    %c0_i32_0 = arith.constant 0 : i32
    %c0_i32_1 = arith.constant 0 : i32
    return %c0_i32, %c0_i32_0 : i32, i32
  }
  func.func @transform_8(%arg0: i32) -> (i32, i32, i32) {
    %c0_i32 = arith.constant 0 : i32
    %c0_i32_0 = arith.constant 0 : i32
    %c0_i32_1 = arith.constant 0 : i32
    return %arg0, %c0_i32, %c0_i32_0 : i32, i32, i32
  }
  func.func @transform_9(%arg0: i32) -> (i32, i32, i32) {
    %c0_i32 = arith.constant 0 : i32
    %c0_i32_0 = arith.constant 0 : i32
    %c0_i32_1 = arith.constant 0 : i32
    %c0_i32_2 = arith.constant 0 : i32
    return %c0_i32, %c0_i32_0, %c0_i32_1 : i32, i32, i32
  }
  func.func @transform_10(%arg0: i32) -> (i32, i32, i32) {
    %c0_i32 = arith.constant 0 : i32
    %c0_i32_0 = arith.constant 0 : i32
    %c0_i32_1 = arith.constant 0 : i32
    %c0_i32_2 = arith.constant 0 : i32
    return %c0_i32, %c0_i32_0, %c0_i32_1 : i32, i32, i32
  }
  func.func @transform_11(%arg0: i32) -> (i32, i32, i32) {
    %c0_i32 = arith.constant 0 : i32
    %c0_i32_0 = arith.constant 0 : i32
    %c0_i32_1 = arith.constant 0 : i32
    %c0_i32_2 = arith.constant 0 : i32
    return %c0_i32, %c0_i32_0, %c0_i32_1 : i32, i32, i32
  }
  func.func @transform_12(%arg0: i32) -> (i32, i32, i32) {
    %c0_i32 = arith.constant 0 : i32
    %c0_i32_0 = arith.constant 0 : i32
    %c0_i32_1 = arith.constant 0 : i32
    %c0_i32_2 = arith.constant 0 : i32
    return %c0_i32, %c0_i32_0, %c0_i32_1 : i32, i32, i32
  }
  func.func @transform_13(%arg0: i32) -> (i32, i32) {
    %c0_i32 = arith.constant 0 : i32
    %c0_i32_0 = arith.constant 0 : i32
    %c0_i32_1 = arith.constant 0 : i32
    return %c0_i32, %c0_i32_0 : i32, i32
  }
}

</mosaic_0001>

<bundles_post_ra>
// kernel: tpu_custom_call.1
= control target key start
LH: loop header
LB: loop body
LE: loop exit
PB: predicated region body
PF: predicated region fallthrough
CT: control target
= control target key end

     0   :  { %19 = vsyncpa [#allocation4], 0  ;;  %s1708_s0 = inlined_call_operand.hbm [shape: f32[8,32], index: 0, kind: input, shape index: {}]   ;;  %s1709_s1 = inlined_call_operand.hbm [shape: f32[32,64], index: 1, kind: input, shape index: {}]   ;;  %s1710_s2 = inlined_call_operand.vmem [shape: f32[1,64], index: 2, kind: input, shape index: {}]   ;;  %s1711_s3 = inlined_call_operand.hbm [shape: f32[1,16,16], index: 3, kind: input, shape index: {}]   ;;  %s1712_s4 = inlined_call_operand.vmem [shape: f32[1,2,16], index: 4, kind: input, shape index: {}]   ;;  %s1713_s5 = inlined_call_operand.vmem [shape: f32[1,1,16], index: 5, kind: input, shape index: {}]   ;;  %s1714_s6 = inlined_call_operand.vmem [shape: f32[1,1,16], index: 6, kind: input, shape index: {}]   ;;  %s1715_s7 = inlined_call_operand.vmem [shape: f32[1,16], index: 7, kind: input, shape index: {}]   ;;  %s1716_s8 = inlined_call_operand.hbm [shape: f32[8,2,16], index: 8, kind: output, shape index: {0}]   ;;  %s1717_s9 = inlined_call_operand.hbm [shape: f32[1,16,16], index: 9, kind: output, shape index: {1}]   ;;  %s1718_s10 = inlined_call_operand.hbm [shape: f32[1,2,16], index: 10, kind: output, shape index: {2}]   ;;  %s1719_s11 = inlined_call_operand.hbm [shape: f32[1,1,16], index: 11, kind: output, shape index: {3}]   ;;  %s1720_s12 = inlined_call_operand.hbm [shape: f32[1,1,16], index: 12, kind: output, shape index: {4}]   ;;  %s1721_s13 = inlined_call_operand.hbm [shape: f32[1,16], index: 13, kind: output, shape index: {5}]  }
   0x1   :  { %20 = vsyncpa [#allocation7], 0 }
   0x2   :  { %21 = vsyncpa [#allocation5], 0 }
   0x3   :  { %22 = vsyncpa [#allocation11], 0 }
   0x4   :  { %23 = vsyncpa [#allocation14], 0 }
   0x5   :  { %24 = vsyncpa [#allocation17], 0  ;;  %s1347_s25 = smov [#allocation6]  }
   0x6   :  { %s40_s26 = sshll.u32 %s1347_s25, 4  ;;  %s41_s26 = int_to_ptr.vmem [resolvable:$true] %s40_s26 }
   0x7   :  { %s1107_s27 = scalar_lea.vmem %s41_s26, 512  ;;  %p1112_p1 = scmp.lt.s32.totalorder %s41_s26, %s41_s26 }
   0x8   :  { %p1108_p0 = scmp.ne.s32.totalorder %s41_s26, %s1107_s27  ;;  %p1113_p2 = scmp.lt.s32.totalorder %s1107_s27, %s1107_s27 }
   0xa   :  { %p1114_p3 = por %p1113_p2, %p1112_p1 }
   0xc   :  { %p1115_p4 = pnand %p1114_p3, %p1108_p0 }
   0xe   :  { %1118 = shalt.err (!%p1115_p4)
}
   0xf   :  { %s1348_s28 = smov 128   ;;  %s1349_s29 = smov 8  }
  0x10   :  { %46 = dma.hbm_to_vmem [thread:$0]  %s1709_s1, 512, %s41_s26, [#allocation7], %s1348_s28, %s1348_s28, %s1349_s29  }
  0x11   :  { %s1350_s15 = smov [#allocation3]   ;;  %s1351_s17 = smov [#allocation8]  }
  0x12   :  { %s31_s16 = sshll.u32 %s1350_s15, 4  ;;  %s54_s18 = sshll.u32 %s1351_s17, 4  ;;  %s32_s16 = int_to_ptr.vmem [resolvable:$true] %s31_s16  ;;  %s55_s18 = int_to_ptr.vmem [resolvable:$true] %s54_s18 }
  0x13   :  { %s1127_s19 = scalar_lea.vmem %s32_s16, 128  ;;  %p1132_p6 = scmp.lt.s32.totalorder %s32_s16, %s32_s16 }
  0x14   :  { %p1128_p5 = scmp.ne.s32.totalorder %s32_s16, %s1127_s19  ;;  %p1133_p7 = scmp.lt.s32.totalorder %s1127_s19, %s1127_s19 }
  0x16   :  { %p1134_p8 = por %p1133_p7, %p1132_p6 }
  0x18   :  { %p1135_p9 = pnand %p1134_p8, %p1128_p5 }
  0x1a   :  { %1138 = shalt.err (!%p1135_p9)
}
  0x1b   :  { %34 = dma.hbm_to_vmem [thread:$0]  %s1708_s0, 128, %s32_s16, [#allocation4]  }
  0x1c   :  { %s1147_s22 = scalar_lea.vmem %s55_s18, 256  ;;  %p1152_p11 = scmp.lt.s32.totalorder %s55_s18, %s55_s18 }
  0x1d   :  { %p1148_p10 = scmp.ne.s32.totalorder %s55_s18, %s1147_s22  ;;  %p1153_p12 = scmp.lt.s32.totalorder %s1147_s22, %s1147_s22 }
  0x1f   :  { %p1154_p13 = por %p1153_p12, %p1152_p11 }
  0x21   :  { %p1155_p0 = pnand %p1154_p13, %p1148_p10 }
  0x23   :  { %1158 = shalt.err (!%p1155_p0)
}
  0x24   :  { %60 = dma.hbm_to_vmem [thread:$0]  %s1711_s3, 256, %s55_s18, [#allocation7], %s1348_s28, %s1348_s28, %s1349_s29  }
  0x25   :  { %1307 = dma.done.wait [#allocation4], 128  }
  0x26   :  { %1308 = vsyncadd [#allocation4], 4294967168 }
  0x27   :  { %1309 = dma.done.wait [#allocation7], 768  }
  0x28   :  { %1310 = vsyncadd [#allocation7], 4294966528  ;;  %v78_v0 = vlaneseq  ;;  %v1352_v1 = vmov 0.0   ;;  %vm1353_vm0 = vmmov 0   ;;  %vm99_vm2 = vcmask 123904   ;;  %v112_v11 = vld [vmem:[#allocation6 + $0x18] sm:$0xff] }
  0x29   :  { %937 = vmatprep.subr.mxu0 %v1352_v1  ;;  %945 = vmatprep.mubr.msk.f32.mxu0 %vm1353_vm0, %v1352_v1  ;;  %vm102_vm3 = vcmask 122880   ;;  %v98_v6 = vld [vmem:[%s1712_s4] sm:$0x3]  ;;  %v110_v13 = vld [vmem:[#allocation6 + $0x8] sm:$0xff]  ;;  %v109_v14 = vld [vmem:[#allocation6] sm:$0xff]  ;;  %vm120_vm5 = vcmask 261120  }
  0x2a   :  { %v1471_v2 = vshrl.u32 %v78_v0, 7  ;;  %v1473_v3 = vand.u32 127, %v78_v0  ;;  %v101_v7 = vld [vmem:[%s1713_s5] sm:$0x1]  ;;  %100 = vst.msk [vmem:[#allocation12] sm:$0x3] %vm99_vm2, %v98_v6  ;;  %938 = vmatpush3.msra.mxu0 %v112_v11 }
  0x2b   :  { %v104_v8 = vld [vmem:[%s1714_s6] sm:$0x1]  ;;  %103 = vst.msk [vmem:[#allocation13] sm:$0x1] %vm102_vm3, %v101_v7  ;;  %939 = vmatprep.subr.mxu0 %v1352_v1  ;;  %v108_v15 = vld [vmem:[#allocation3] sm:$0xff]  ;;  %vm95_vm6 = vcmask 130048  }
  0x2c   :  { %v1476_v4 = vadd.s32 8, %v1471_v2  ;;  %vm83_vm1 = vcmp.eq.s32.totalorder %v1471_v2, %v1473_v3  ;;  %105 = vst.msk [vmem:[#allocation15] sm:$0x1] %vm102_vm3, %v104_v8  ;;  %v106_v9 = vld [vmem:[%s1715_s7] sm:$0x1]  ;;  %v93_v27 = vld [vmem:[#allocation8] sm:$0xff] }
  0x2d   :  { %v1480_v5 = vsel %vm83_vm1, 1.0, %v1352_v1  ;;  %v111_v12 = vld [vmem:[#allocation6 + $0x10] sm:$0xff]  ;;  %107 = vst.msk [vmem:[#allocation16] sm:$0x1] %vm102_vm3, %v106_v9  ;;  %v94_v28 = vld [vmem:[#allocation8 + $0x8] sm:$0xff]  ;;  %s1355_s6 = smov 86  }
  0x2e   :  { %vm84_vm4 = vcmp.eq.s32.totalorder %v1476_v4, %v1473_v3  ;;  %940 = vmatpush3.msra.mxu0 %v111_v12  ;;  %v904_v20 = vld [vmem:[%s1710_s2] ss:$0 sm:$0xff]  ;;  %96 = vst.msk [vmem:[#allocation10] sm:$0xff] %vm95_vm6, %v93_v27  ;;  %97 = vst.msk [vmem:[#allocation10 + $0x8] sm:$0xff] %vm95_vm6, %v94_v28  ;;  %s1354_s2 = smov 90   ;;  %s1356_s7 = smov 88  }
  0x2f   :  { %v1499_v10 = vsel %vm84_vm4, 1.0, %v1352_v1  ;;  %941 = vmatprep.subr.mxu0 %v1352_v1  ;;  %s1357_s15 = smov 127   ;;  %s1358_s16 = smov 96   ;;  %vm207_vm7 = vcmask 7168   ;;  %vm246_vm8 = vcmask 31744   ;;  %vm248_vm9 = vcmask 39936  }
  0x30   :  { %942 = vmatpush3.msra.mxu0 %v110_v13  ;;  %s1359_s17 = smov 98   ;;  %s1360_s18 = smov 75   ;;  %vm250_vm11 = vcmask 48128   ;;  %vm252_vm13 = vcmask 56320   ;;  %vm254_vm14 = vcmask 72704   ;;  %vm265_vm15 = vcmask 392192  }
  0x31   :  { %943 = vmatprep.subr.mxu0 %v1352_v1  ;;  %v1502_v16 = vld [vmem:[#allocation12] sm:$0x3]   ;;  %s1361_s19 = smov 7   ;;  %s1362_s20 = smov 118   ;;  %vm267_vm0 = vcmask 523264  }
  0x32   :  { %v1504_v17 = vld [vmem:[#allocation13] sm:$0x1]   ;;  %944 = vmatpush3.msra.mxu0 %v109_v14  ;;  %s1363_s21 = smov 48   ;;  %s1546_s22 = smov 0  }
  0x33   :  { %v1506_v18 = vld [vmem:[#allocation15] sm:$0x1]   ;;  %946 = vmatmul.mubr.msk.f32.vlgmr.msra.gmra.mxu0 %vm120_vm5, %v108_v15 }
  0x34   :  { %v1508_v19 = vld [vmem:[#allocation16] sm:$0x1]  }
  0x35   :  { %v1519_v29 = vld [vmem:[#allocation10] sm:$0xff]   ;;  %v1521_v30 = vld [vmem:[#allocation10 + $0x8] sm:$0xff]  }
  0xf3   :  { %v190_v21 = vpop.f32.mrf.mxu0 }
  0xf4   :  { %v1514_v22 = vadd.f32 %v904_v20, %v190_v21 }
  0xf5   :  { %v947_v23 = vpop.f32.mrf.mxu0 }
  0xf6   :  { %v906_v24 = vmul.f32 -1.442695, %v1514_v22 }
  0xf8   :  { %1071 = vpow2.f32 %v906_v24 }
 0x105   :  { %v1072_v25 = vpop.eup %1071 }
 0x106   :  { %v197_v26 = vadd.f32 1.0, %v1072_v25 }
 0x108   :  { %1073 = vrcp.f32 %v197_v26 }
 0x115   :  { %v1074_v31 = vpop.eup %1073 }
 0x116   :  { %201 = vrot.lane.b32.xlu1 %v1074_v31, %s1354_s2  ;;  %v213_v32 = vmul.f32 %v1074_v31, %v1074_v31  ;;  %v263_v56 = vsel %vm95_vm6, %v1514_v22, %v1074_v31 }
 0x118   :  { %215 = vrot.lane.b32.xlu0 %v213_v32, %s1355_s6 }
 0x11a   :  { %204 = vrot.lane.b32.xlu1 %v1074_v31, %s1356_s7 }
 0x11c   :  { %209 = vrot.lane.b32.xlu0 %v1074_v31, %s1357_s15 }
 0x11e   :  { %229 = vrot.lane.b32.xlu1 %v1074_v31, %s1358_s16 }
 0x188   :  { %v202_v36 = vpop.permute.xlu1 %201 }
 0x18a   :  { %v216_v33 = vpop.permute.xlu0 %215 }
 0x18b   :  { %v219_v34 = vsel %vm95_vm6, %v216_v33, 0.0 }
 0x18c   :  { %220 = vadd.xlane.f32.xlu0 %v219_v34  ;;  %v205_v38 = vpop.permute.xlu1 %204 }
 0x18d   :  { %v208_v39 = vsel %vm207_vm7, %v202_v36, %v205_v38 }
 0x18e   :  { %v210_v35 = vpop.permute.xlu0 %209 }
 0x18f   :  { %v212_v37 = vmul.f32 %v1074_v31, %v210_v35 }
 0x190   :  { %v230_v41 = vpop.permute.xlu1 %229 }
 0x191   :  { %233 = vrot.lane.b32.xlu1 %v212_v37, %s1359_s17 }
 0x195   :  { %237 = vrot.lane.b32.xlu1 %v1514_v22, %s1360_s18 }
 0x199   :  { %241 = vrot.lane.b32.xlu1 %v208_v39, %s1361_s19 }
 0x19d   :  { %256 = vrot.lane.b32.xlu1 %v1074_v31, %s1362_s20 }
 0x203   :  { %v234_v42 = vpop.permute.xlu1 %233 }
 0x204   :  { %v247_v47 = vsel %vm246_vm8, %v230_v41, %v234_v42 }
 0x207   :  { %v238_v43 = vpop.permute.xlu1 %237 }
 0x208   :  { %v249_v49 = vsel %vm248_vm9, %v247_v47, %v238_v43 }
 0x20b   :  { %v242_v51 = vpop.permute.xlu1 %241 }
 0x20f   :  { %v257_v55 = vpop.permute.xlu1 %256 }
 0x210   :  { %v264_v57 = vsel %vm120_vm5, %v263_v56, %v257_v55 }
 0x215   :  { %v221_v40 = vpop.xlane.xlu0 %220 }
 0x216   :  { %1075 = vrsqrt.f32 %v221_v40  ;;  %vm224_vm10 = vcmp.eq.f32.partialorder %v221_v40, inf  ;;  %v227_v46 = vand.u32 2147483648, %v221_v40  ;;  %vm226_vm12 = vcmp.eq.f32.partialorder %v221_v40, 0.0 }
 0x223   :  { %v1076_v44 = vpop.eup %1075 }
 0x224   :  { %v223_v45 = vmul.f32 %v1076_v44, %v221_v40 }
 0x226   :  { %v225_v48 = vsel %vm224_vm10, %v221_v40, %v223_v45 }
 0x227   :  { %v228_v50 = vsel %vm226_vm12, %v227_v46, %v225_v48 }
 0x228   :  { %v251_v52 = vsel %vm250_vm11, %v249_v49, %v228_v50 }
 0x229   :  { %v253_v53 = vsel %vm252_vm13, %v251_v52, %v242_v51 }
 0x22a   :  { %v255_v54 = vsel %vm254_vm14, %v253_v53, 0.0 }
 0x22b   :  { %260 = vrot.lane.b32.xlu1 %v255_v54, %s1363_s21 }
 0x29d   :  { %v261_v58 = vpop.permute.xlu1 %260 }
 0x29e   :  { %v266_v59 = vsel %vm265_vm15, %v264_v57, %v261_v58 }
 0x29f   :  { %268 = vst.msk [vmem:[#allocation2] sm:$0xff] %vm267_vm0, %v266_v59 }
 0x2a0 LB: > { %v1364_v60 = vmov 49   ;;  %v1365_v61 = vmov 48   ;;  %v1366_v62 = vmov 0.0   ;;  %v395_v63 = vmul.f32 %v1337_v30, %v1337_v30  ;;  %s291_s1 = scalar_lea.vmem [#allocation2], %s1345_s22  ;;  %s1368_s23 = smov 96   ;;  %s1345_s22 = sphi %s1546_s22, %s282_s22   ;;  %v1341_v29 = vphi %v1519_v29, %v1728_v29   ;;  %v1337_v30 = vphi %v1521_v30, %v1727_v30   ;;  %v1333_v16 = vphi %v1502_v16, %v1726_v16   ;;  %v1329_v17 = vphi %v1504_v17, %v1725_v17   ;;  %v1325_v18 = vphi %v1506_v18, %v1724_v18   ;;  %v1321_v19 = vphi %v1508_v19, %v1723_v19  }
 0x2a1   : > { %1078 = vset.pattern.permute.xlu1 %v1364_v60  ;;  %1077 = vset.pattern.permute.xlu0 %v1365_v61  ;;  %vm1367_vm1 = vmmov 0   ;;  %v394_v1 = vmul.f32 %v1341_v29, %v1341_v29  ;;  %v1369_v6 = vmov 1.0   ;;  %v1370_v7 = vmov 54   ;;  %s1374_s0 = smov 112   ;;  %s919_s3 = sshll.u32 %s1345_s22, 1 }
 0x2a2   : > { %955 = vmatprep.subr.mxu1 %v1366_v62  ;;  %959 = vmatprep.mubr.msk.f32.mxu1 %vm1367_vm1, %v1366_v62  ;;  %v1371_v8 = vmov 53   ;;  %v308_v11 = vrot.slane %v1333_v16, 1  ;;  %v293_v12 = vsub.f32 1.0, %v1321_v19  ;;  %v294_v13 = vsub.f32 1.0, %v1329_v17  ;;  %s777_s24 = scalar_lea.vmem [#allocation9], %s919_s3  ;;  %s282_s22 = sadd.s32 1, %s1345_s22  }
 0x2a3   : > { %948 = vmatprep.subr.mxu0 %v1366_v62  ;;  %952 = vmatprep.mubr.msk.f32.mxu0 %vm1367_vm1, %v1366_v62  ;;  %v1598_v27 = vsub.s32 0, %v1471_v2  ;;  %v1372_v34 = vmov 50   ;;  %vm527_vm4 = vcmp.lt.s32.totalorder %v1473_v3, %v1476_v4  ;;  %vm526_vm5 = vcmp.lt.s32.totalorder %v1473_v3, %v1471_v2  ;;  %p281_p1 = scmp.ge.s32.totalorder %s282_s22, 8 }
 0x2a4   : > { %956 = vmatpush3.xpose.msk.msra.mxu1 %vm95_vm6, %v395_v63  ;;  %949 = vmatpush3.xpose.msk.msra.mxu0 %vm95_vm6, %v1337_v30  ;;  %v295_v20 = vmul.f32 %v294_v13, %v293_v12  ;;  %v1373_v58 = vmov 51   ;;  %v1375_v13 = vmov 56   ;;  %s1378_s25 = smov (%p281_p1), [#allocation10]   ;;  %s1379_s27 = smov (%p281_p1), [#allocation13]  }
 0x2a5   : > { %957 = vmatprep.subr.mxu1 %v1366_v62  ;;  %950 = vmatprep.subr.mxu0 %v1366_v62  ;;  %s805_s26 = sshll.u32 (%p281_p1), %s1378_s25, 4  ;;  %s828_s30 = sshll.u32 (%p281_p1), %s1379_s27, 4  ;;  %s806_s26 = int_to_ptr.vmem [resolvable:$true] %s805_s26  ;;  %s829_s30 = int_to_ptr.vmem [resolvable:$true] %s828_s30 }
 0x2a6   : > { %v1569_v0 = vld [vmem:[%s291_s1] sm:$0x1]  ;;  %v296_v23 = vadd.f32 %v1321_v19, %v295_v20  ;;  %s1159_s14 = scalar_lea.vmem (%p281_p1), %s806_s26, 256  ;;  %p1164_p3 = scmp.lt.s32.totalorder (%p281_p1), %s806_s26, %s806_s26 }
 0x2a7   : > { %314 = vrot.lane.b32.xlu0 %v1569_v0, %s1368_s23  ;;  %304 = vperm.xlu1 %1078, %v1569_v0   ;;  %v634_v57 = vsub.f32 1.0, %v1569_v0  ;;  %p1160_p2 = scmp.ne.s32.totalorder (%p281_p1), %s806_s26, %s1159_s14  ;;  %p1165_p4 = scmp.lt.s32.totalorder (%p281_p1), %s1159_s14, %s1159_s14 }
 0x2a8   : > { %958 = vmatpush3.xpose.msk.msra.mxu1 %vm95_vm6, %v394_v1  ;;  %951 = vmatpush3.xpose.msk.msra.mxu0 %vm95_vm6, %v1341_v29 }
 0x2a9   : > { %962 = vmatprep.subr.mxu0 %v1366_v62  ;;  %969 = vmatprep.subr.mxu1 %v1366_v62  ;;  %p1166_p5 = por (%p281_p1), %p1165_p4, %p1164_p3 }
 0x2ab   : > { %299 = vperm.xlu0 %1077, %v1569_v0   ;;  %960 = vmatmul.mubr.msk.f32.vlgmr.msra.gmra.mxu1 %vm95_vm6, %v1369_v6  ;;  %p1167_p6 = pnand (%p281_p1), %p1166_p5, %p1160_p2 }
 0x2ac   : > { %973 = vmatprep.mubr.msk.f32.mxu1 %vm1367_vm1, %v1366_v62  ;;  %1079 = vset.pattern.permute.xlu1 %v1370_v7 }
 0x2af   : > { %1080 = vset.pattern.permute.xlu0 %v1371_v8 }
 0x319   : > { %v315_v9 = vpop.permute.xlu0 %314 }
 0x31a   : > { %953 = vmatmul.mubr.msk.f32.vlgmr.msra.gmra.mxu0 %vm95_vm6, %v315_v9 }
 0x31b   : > { %966 = vmatprep.mubr.msk.f32.mxu0 %vm1367_vm1, %v1366_v62  ;;  %vm701_vm1 = vcmask 1040384  }
 0x322   : > { %v305_v14 = vpop.permute.xlu1 %304 }
 0x323   : > { %v310_v15 = vmul.f32 %v308_v11, %v305_v14  ;;  %v1376_v14 = vmov 55  }
 0x326   : > { %v300_v21 = vpop.permute.xlu0 %299 }
 0x327   : > { %v302_v22 = vmul.f32 %v1333_v16, %v300_v21 }
 0x329   : > { %v311_v24 = vmul.f32 %v310_v15, %v302_v22 }
 0x32b   : > { %v312_v25 = vsub.f32 1.0, %v311_v24 }
 0x32d   : > { %v1595_v26 = vmul.f32 %v312_v25, %v296_v23 }
 0x32f   : > { %v506_v28 = vmul.f32 0.999, %v1595_v26 }
 0x331   : > { %v1601_v31 = vadd.f32 0.001, %v506_v28 }
 0x333   : > { %v512_v17 = vrot.slane %v1601_v31, %v1598_v27  ;;  %v619_v9 = vsub.f32 1.0, %v1601_v31 }
 0x335   : > { %v515_v32 = vmul.f32 %v1499_v10, %v512_v17  ;;  %v514_v33 = vmul.f32 %v1480_v5, %v512_v17 }
 0x337   : > { %v519_v16 = vsel %vm95_vm6, %v515_v32, 0.0  ;;  %v516_v19 = vsel %vm95_vm6, %v514_v33, 0.0 }
 0x338   : > { %520 = vadd.xlane.f32.xlu1 %v519_v16  ;;  %517 = vadd.xlane.f32.xlu0 %v516_v19 }
 0x349   : > { %483 = vperm.xlu1 %1079, %v1569_v0  }
 0x34d   : > { %1081 = vset.pattern.permute.xlu1 %v1372_v34 }
 0x34e   : > { %490 = vperm.xlu0 %1080, %v1569_v0  }
 0x352   : > { %1084 = vset.pattern.permute.xlu0 %v1376_v14 }
 0x36b   : > { %v471_v35 = vpop.f32.mrf.mxu1 }
 0x36c   : > { %1087 = vrsqrt.f32 %v471_v35  ;;  %vm477_vm10 = vcmp.eq.f32.partialorder %v471_v35, inf  ;;  %v480_v41 = vand.u32 2147483648, %v471_v35  ;;  %vm479_vm15 = vcmp.eq.f32.partialorder %v471_v35, 0.0 }
 0x36d   : > { %v961_v36 = vpop.f32.mrf.mxu1  ;;  %1089 = vlog2.f32 %v1601_v31 }
 0x379   : > { %v1088_v37 = vpop.eup %1087 }
 0x37a   : > { %v476_v40 = vmul.f32 %v1088_v37, %v471_v35  ;;  %v1090_v45 = vpop.eup %1089 }
 0x37b   : > { %v537_v49 = vmul.f32 0.6931472, %v1090_v45 }
 0x37c   : > { %v478_v42 = vsel %vm477_vm10, %v471_v35, %v476_v40 }
 0x37d   : > { %v481_v46 = vsel %vm479_vm15, %v480_v41, %v478_v42 }
 0x3c1   : > { %v521_v38 = vpop.xlane.xlu1 %520  ;;  %v518_v39 = vpop.xlane.xlu0 %517 }
 0x3c2   : > { %vm523_vm7 = vcmp.lt.f32.partialorder %v512_v17, %v521_v38  ;;  %vm525_vm8 = vcmp.eq.f32.partialorder %v512_v17, %v521_v38  ;;  %vm524_vm9 = vcmp.eq.f32.partialorder %v512_v17, %v518_v39  ;;  %vm522_vm12 = vcmp.lt.f32.partialorder %v512_v17, %v518_v39 }
 0x3c3   : > { %vm529_vm11 = vmand %vm525_vm8, %vm527_vm4 }
 0x3c4   : > { %vm531_vm13 = vmor %vm523_vm7, %vm529_vm11 }
 0x3c5   : > { %vm528_vm14 = vmand %vm524_vm9, %vm526_vm5  ;;  %v914_v43 = vsel %vm531_vm13, 1.0, %v1366_v62  ;;  %v484_v44 = vpop.permute.xlu1 %483 }
 0x3c6   : > { %vm530_vm0 = vmor %vm522_vm12, %vm528_vm14  ;;  %963 = vmatpush3.xpose.msk.msra.mxu0 %vm95_vm6, %v914_v43  ;;  %v486_v47 = vmul.f32 %v484_v44, %v481_v46  ;;  %v1377_v43 = vmov 52   ;;  %v681_v46 = vrot.slane %v1569_v0, %v1598_v27 }
 0x3c7   : > { %964 = vmatprep.subr.mxu0 %v1366_v62  ;;  %v913_v48 = vsel %vm530_vm0, 1.0, %v1366_v62 }
 0x3c8   : > { %1091 = vrcp.f32 %v486_v47 }
 0x3c9   : > { %v491_v52 = vpop.permute.xlu0 %490 }
 0x3ca   : > { %965 = vmatpush3.xpose.msk.msra.mxu0 %vm95_vm6, %v913_v48 }
 0x3cd   : > { %967 = vmatmul.mubr.msk.f32.vlgmr.msra.gmra.mxu0 %vm95_vm6, %v537_v49 }
 0x3d5   : > { %v1092_v50 = vpop.eup %1091 }
 0x3da   : > { %v390_v51 = vpop.f32.mrf.mxu0 }
 0x3db   : > { %v488_v53 = vmul.f32 %v1092_v50, %v390_v51 }
 0x3dc   : > { %v954_v54 = vpop.f32.mrf.mxu0 }
 0x3dd   : > { %v493_v55 = vmul.f32 %v491_v52, %v488_v53 }
 0x3df   : > { %v495_v56 = vsel %vm102_vm3, %v493_v55, -inf }
 0x3e0   : > { %496 = vmax.xlane.f32.xlu1 %v495_v56 }
 0x3f1   : > { %630 = vperm.xlu1 %1081, %v1569_v0  }
 0x3f5   : > { %637 = vperm.xlu1 %1081, %v634_v57  }
 0x3f9   : > { %1082 = vset.pattern.permute.xlu1 %v1373_v58 }
 0x3fa   : > { %643 = vperm.xlu1 %1082, %v1569_v0  }
 0x3fe   : > { %1083 = vset.pattern.permute.xlu1 %v1375_v13 }
 0x469   : > { %v497_v59 = vpop.xlane.xlu1 %496 }
 0x46a   : > { %v498_v60 = vsub.f32 %v493_v55, %v497_v59 }
 0x46c   : > { %v499_v61 = vmul.f32 1.442695, %v498_v60 }
 0x46d   : > { %v631_v20 = vpop.permute.xlu1 %630 }
 0x46e   : > { %1093 = vpow2.f32 %v499_v61 }
 0x471   : > { %v638_v22 = vpop.permute.xlu1 %637 }
 0x475   : > { %v644_v28 = vpop.permute.xlu1 %643 }
 0x47b   : > { %v1094_v63 = vpop.eup %1093 }
 0x47c   : > { %v501_v1 = vsel %vm102_vm3, %v1094_v63, 0.0 }
 0x47d   : > { %502 = vadd.xlane.f32.xlu0 %v501_v1 }
 0x48d   : > { %v613_v6 = vpop.f32.mrf.mxu0 }
 0x48e   : > { %v617_v7 = vmul.f32 1.442695, %v613_v6 }
 0x48f   : > { %v968_v8 = vpop.f32.mrf.mxu0 }
 0x490   : > { %1095 = vpow2.f32 %v617_v7 }
 0x493   : > { %659 = vrot.lane.b32.xlu0 %v1569_v0, %s1374_s0 }
 0x49d   : > { %v1096_v11 = vpop.eup %1095 }
 0x49e   : > { %v1629_v12 = vmul.f32 %v1096_v11, %v619_v9 }
 0x4a0   : > { %v633_v24 = vmul.f32 %v631_v20, %v1629_v12 }
 0x506   : > { %v503_v15 = vpop.xlane.xlu0 %502 }
 0x507   : > { %1097 = vrcp.f32 %v503_v15 }
 0x50a   : > { %v660_v32 = vpop.permute.xlu0 %659 }
 0x514   : > { %v1098_v21 = vpop.eup %1097 }
 0x515   : > { %v505_v23 = vmul.f32 %v1098_v21, %v1094_v63 }
 0x517   : > { %v640_v25 = vmul.f32 %v638_v22, %v505_v23 }
 0x519   : > { %v641_v17 = vadd.f32 %v640_v25, %v633_v24 }
 0x51b   : > { %v1632_v17 = vmul.f32 %v644_v28, %v641_v17  }
 0x51d   : > { %v1722_v31 = vmov %v1632_v17 }
 0x51e   : > { %v662_v33 = vmul.f32 %v660_v32, %v1722_v31  ;;  %v650_v16 = vrot.slane %v1722_v31, %v1598_v27  ;;  %v686_v44 = vsel %vm102_vm3, %v1722_v31, 0.0  ;;  %v1725_v17 = vmov %v1722_v31  ;;  %785 = vst.msk [vmem:[#allocation13] sm:$0x1] (%p281_p1), %vm102_vm3, %v1722_v31 }
 0x520   : > { %v663_v19 = vsub.f32 1.0, %v662_v33  ;;  %v652_v34 = vmul.f32 %v1499_v10, %v650_v16  ;;  %v651_v37 = vmul.f32 %v1480_v5, %v650_v16 }
 0x522   : > { %v656_v35 = vsel %vm95_vm6, %v652_v34, 0.0  ;;  %v667_v36 = vrot.slane %v663_v19, %v1598_v27  ;;  %v653_v40 = vsel %vm95_vm6, %v651_v37, 0.0 }
 0x523   : > { %657 = vadd.xlane.f32.xlu1 %v656_v35 }
 0x524   : > { %v669_v38 = vmul.f32 %v1499_v10, %v667_v36  ;;  %v668_v41 = vmul.f32 %v1480_v5, %v667_v36 }
 0x526   : > { %v673_v39 = vsel %vm95_vm6, %v669_v38, 0.0  ;;  %v670_v42 = vsel %vm95_vm6, %v668_v41, 0.0 }
 0x527   : > { %674 = vadd.xlane.f32.xlu0 %v673_v39  ;;  %654 = vadd.xlane.f32.xlu1 %v653_v40 }
 0x52b   : > { %671 = vadd.xlane.f32.xlu1 %v670_v42 }
 0x53c   : > { %697 = vperm.xlu1 %1083, %v1569_v0  }
 0x53d   : > { %693 = vperm.xlu0 %1084, %v1569_v0  }
 0x541   : > { %1085 = vset.pattern.permute.xlu0 %v1377_v43 }
 0x542   : > { %623 = vperm.xlu0 %1085, %v1569_v0  }
 0x546   : > { %1086 = vset.pattern.permute.xlu0 %v1375_v13 }
 0x560   : > { %687 = vadd.xlane.f32.xlu1 %v686_v44 }
 0x5ac   : > { %v658_v45 = vpop.xlane.xlu1 %657 }
 0x5ad   : > { %v683_v49 = vmul.f32 %v681_v46, %v658_v45 }
 0x5b0   : > { %v675_v47 = vpop.xlane.xlu0 %674  ;;  %v655_v48 = vpop.xlane.xlu1 %654 }
 0x5b1   : > { %v677_v50 = vmul.f32 %v1337_v30, %v675_v47  ;;  %v682_v53 = vmul.f32 %v681_v46, %v655_v48  ;;  %v621_v30 = vsub.f32 1.0, %v1595_v26 }
 0x5b3   : > { %v685_v51 = vadd.f32 %v683_v49, %v677_v50  }
 0x5b4   : > { %v672_v52 = vpop.xlane.xlu1 %671 }
 0x5b5   : > { %v676_v54 = vmul.f32 %v1341_v29, %v672_v52  ;;  %970 = vmatpush3.msra.mxu1 %v685_v51  ;;  %781 = vst.msk [vmem:[#allocation10 + $0x8] sm:$0xff] (%p281_p1), %vm95_vm6, %v685_v51 }
 0x5b6   : > { %971 = vmatprep.subr.mxu1 %v1366_v62 }
 0x5b7   : > { %v684_v55 = vadd.f32 %v682_v53, %v676_v54  }
 0x5b8   : > { %v698_v56 = vpop.permute.xlu1 %697  ;;  %v694_v57 = vpop.permute.xlu0 %693 }
 0x5b9   : > { %v699_v58 = vrot.slane %v698_v56, 7  ;;  %972 = vmatpush3.msra.mxu1 %v684_v55  ;;  %780 = vst.msk [vmem:[#allocation10] sm:$0xff] (%p281_p1), %vm95_vm6, %v684_v55 }
 0x5bb   : > { %v702_v0 = vsel %vm701_vm1, %v694_v57, %v699_v58  }
 0x5bc   : > { %974 = vmatmul.mubr.msk.f32.vlgmr.msra.gmra.mxu1 %vm95_vm6, %v702_v0  ;;  %v1726_v16 = vmov %v702_v0  ;;  %783 = vst.msk [vmem:[#allocation12] sm:$0x3] (%p281_p1), %vm99_vm2, %v702_v0 }
 0x5bd   : > { %v624_v27 = vpop.permute.xlu0 %623 }
 0x5be   : > { %v626_v59 = vmul.f32 %v624_v27, %v621_v30  ;;  %v1727_v30 = vmov %v685_v51 }
 0x5c0   : > { %v627_v60 = vmul.f32 %v626_v59, %v1629_v12 }
 0x5c2   : > { %v628_v61 = vadd.f32 %v627_v60, %v1595_v26  }
 0x5c4   : > { %v1723_v19 = vmov %v628_v61  ;;  %787 = vst.msk [vmem:[#allocation16] sm:$0x1] (%p281_p1), %vm102_vm3, %v628_v61 }
 0x5e9   : > { %v688_v29 = vpop.xlane.xlu1 %687 }
 0x5ea   : > { %v689_v62 = vsub.f32 1.0, %v688_v29  ;;  %v1728_v29 = vmov %v684_v55 }
 0x5ec   : > { %v690_v63 = vmul.f32 %v1325_v18, %v689_v62 }
 0x5ee   : > { %v691_v1 = vadd.f32 %v690_v63, %v1722_v31  }
 0x5f0   : > { %v1724_v18 = vmov %v691_v1  ;;  %786 = vst.msk [vmem:[#allocation15] sm:$0x1] (%p281_p1), %vm102_vm3, %v691_v1 }
 0x67a   :  { %284 = sbr.rel (!%p281_p1) target bundleno = 672 (0x2a0), region = 117 }
 0x67c   : > { %v772_v6 = vpop.f32.mrf.mxu1 }
 0x67d   : > { %779 = vst.msk [vmem:[%s777_s24] sm:$0x3] %vm99_vm2, %v772_v6 }
 0x67e   : > { %v975_v7 = vpop.f32.mrf.mxu1 }
 0x67f   :  { %1170 = shalt.err (!%p1167_p6)
}
 0x680   :  { %811 = dma.vmem_to_hbm [thread:$0]  %s806_s26, 256, %s1717_s9, [#allocation11], %s1348_s28, %s1348_s28, %s1349_s29  }
 0x681   :  { %s1179_s2 = scalar_lea.vmem %s829_s30, 16  ;;  %s1183_s6 = scalar_lea.vmem %s829_s30, 32 }
 0x682   :  { %p1180_p7 = scmp.ne.s32.totalorder %s829_s30, %s1179_s2  ;;  %p1184_p8 = scmp.lt.s32.totalorder %s829_s30, %s829_s30 }
 0x683   :  { %p1185_p9 = scmp.lt.s32.totalorder %s1183_s6, %s1179_s2 }
 0x685   :  { %p1186_p10 = por %p1185_p9, %p1184_p8 }
 0x687   :  { %p1187_p11 = pnand %p1186_p10, %p1180_p7 }
 0x689   :  { %1190 = shalt.err (!%p1187_p11)
}
 0x68a   :  { %831 = dma.vmem_to_hbm [thread:$0]  %s829_s30, 16, %s1719_s11, [#allocation14]  }
 0x68b   :  { %s1380_s16 = smov [#allocation9]  }
 0x68c   :  { %s793_s17 = sshll.u32 %s1380_s16, 4  ;;  %s794_s17 = int_to_ptr.vmem [resolvable:$true] %s793_s17 }
 0x68d   :  { %s1199_s18 = scalar_lea.vmem %s794_s17, 256  ;;  %p1204_p13 = scmp.lt.s32.totalorder %s794_s17, %s794_s17 }
 0x68e   :  { %p1200_p12 = scmp.ne.s32.totalorder %s794_s17, %s1199_s18  ;;  %p1205_p0 = scmp.lt.s32.totalorder %s1199_s18, %s1199_s18 }
 0x690   :  { %p1206_p1 = por %p1205_p0, %p1204_p13 }
 0x692   :  { %p1207_p2 = pnand %p1206_p1, %p1200_p12 }
 0x694   :  { %1210 = shalt.err (!%p1207_p2)
}
 0x695   :  { %s1381_s9 = smov 32   ;;  %s1382_s28 = smov 2  }
 0x696   :  { %799 = dma.vmem_to_hbm [thread:$0]  %s794_s17, 256, %s1716_s8, [#allocation5], %s1381_s9, %s1381_s9, %s1382_s28  }
 0x697   :  { %s1383_s20 = smov [#allocation12]   ;;  %s1384_s11 = smov [#allocation15]  }
 0x698   :  { %s818_s21 = sshll.u32 %s1383_s20, 4  ;;  %s838_s22 = sshll.u32 %s1384_s11, 4  ;;  %s819_s21 = int_to_ptr.vmem [resolvable:$true] %s818_s21  ;;  %s839_s22 = int_to_ptr.vmem [resolvable:$true] %s838_s22 }
 0x699   :  { %s1219_s1 = scalar_lea.vmem %s819_s21, 32  ;;  %p1224_p4 = scmp.lt.s32.totalorder %s819_s21, %s819_s21 }
 0x69a   :  { %p1220_p3 = scmp.ne.s32.totalorder %s819_s21, %s1219_s1  ;;  %p1225_p5 = scmp.lt.s32.totalorder %s1219_s1, %s1219_s1 }
 0x69c   :  { %p1226_p6 = por %p1225_p5, %p1224_p4 }
 0x69e   :  { %p1227_p7 = pnand %p1226_p6, %p1220_p3 }
 0x6a0   :  { %1230 = shalt.err (!%p1227_p7)
}
 0x6a1   :  { %821 = dma.vmem_to_hbm [thread:$0]  %s819_s21, 32, %s1718_s10, [#allocation11]  }
 0x6a2   :  { %s1239_s3 = scalar_lea.vmem %s839_s22, 16  ;;  %s1243_s8 = scalar_lea.vmem %s839_s22, 32 }
 0x6a3   :  { %p1240_p8 = scmp.ne.s32.totalorder %s839_s22, %s1239_s3  ;;  %p1244_p9 = scmp.lt.s32.totalorder %s839_s22, %s839_s22 }
 0x6a4   :  { %p1245_p10 = scmp.lt.s32.totalorder %s1243_s8, %s1239_s3 }
 0x6a6   :  { %p1246_p11 = por %p1245_p10, %p1244_p9 }
 0x6a8   :  { %p1247_p12 = pnand %p1246_p11, %p1240_p8 }
 0x6aa   :  { %1250 = shalt.err (!%p1247_p12)
}
 0x6ab   :  { %841 = dma.vmem_to_hbm [thread:$0]  %s839_s22, 16, %s1720_s12, [#allocation14]  }
 0x6ac   :  { %s1385_s26 = smov [#allocation16]  }
 0x6ad   :  { %s848_s27 = sshll.u32 %s1385_s26, 4  ;;  %s849_s27 = int_to_ptr.vmem [resolvable:$true] %s848_s27 }
 0x6ae   :  { %s1259_s30 = scalar_lea.vmem %s849_s27, 16  ;;  %s1263_s14 = scalar_lea.vmem %s849_s27, 32 }
 0x6af   :  { %p1260_p13 = scmp.ne.s32.totalorder %s849_s27, %s1259_s30  ;;  %p1264_p0 = scmp.lt.s32.totalorder %s849_s27, %s849_s27 }
 0x6b0   :  { %p1265_p1 = scmp.lt.s32.totalorder %s1263_s14, %s1259_s30 }
 0x6b2   :  { %p1266_p2 = por %p1265_p1, %p1264_p0 }
 0x6b4   :  { %p1267_p3 = pnand %p1266_p2, %p1260_p13 }
 0x6b6   :  { %1270 = shalt.err (!%p1267_p3)
}
 0x6b7   :  { %851 = dma.vmem_to_hbm [thread:$0]  %s849_s27, 16, %s1721_s13, [#allocation17]  }
 0x6b8   :  { %1311 = dma.done.wait [#allocation5], 256  }
 0x6b9   :  { %1312 = vsyncadd [#allocation5], 4294967040 }
 0x6ba   :  { %1313 = dma.done.wait [#allocation11], 288  }
 0x6bb   :  { %1314 = vsyncadd [#allocation11], 4294967008 }
 0x6bc   :  { %1315 = dma.done.wait [#allocation14], 32  }
 0x6bd   :  { %1316 = vsyncadd [#allocation14], 4294967264 }
 0x6be   :  { %1317 = dma.done.wait [#allocation17], 16  }
 0x6bf   :  { %1318 = vsyncadd [#allocation17], 4294967280 }
 0x6c0   :  { %870 = vsyncpa [#allocation4], 1 }
 0x6c1   :  { %871 = vsyncpa [#allocation7], 1 }
 0x6c2   :  { %872 = vsyncpa [#allocation5], 1 }
 0x6c3   :  { %873 = vsyncpa [#allocation11], 1 }
 0x6c4   :  { %874 = vsyncpa [#allocation14], 1 }
 0x6c5   :  { %875 = vsyncpa [#allocation17], 1 }

</bundles_post_ra>
